<compile_context>
chip_gen: v7x
topology: tpu7x:2x2x1
jax: 0.10.0
libtpu: 0.0.40
codegen_flags: <defaults>
</compile_context>

<pallas_src>
import jax
import jax.numpy as jnp
from jax.experimental import pallas as pl
from jax.experimental.pallas import tpu as pltpu

TILE_B = 256  # batch tile for real workloads (multiple of 128/256 MXU rows)

# Logical layer sizes from the PyTorch module, and lane-dense padded sizes.
DIMS = [784, 256, 64, 20, 64, 256, 784]
PADDED_DIMS = [784, 256, 128, 128, 128, 256, 784]


def ae_kernel(x_ref,
              w1, b1, w2, b2, w3, b3,
              w4, b4, w5, b5, w6, b6,
              o_ref):
    """Full encoder+decoder MLP on one (tile_b, 784) batch tile."""
    h = x_ref[...].astype(jnp.float32)

    def dense(h, w_ref, b_ref):
        # bf16 operands -> MXU peak rate; accumulate in f32; bias is [1, out].
        return jnp.dot(h.astype(jnp.bfloat16), w_ref[...],
                       preferred_element_type=jnp.float32) + b_ref[...]

    # Encoder: Linear + ReLU x3
    h = jnp.maximum(dense(h, w1, b1), 0.0)
    h = jnp.maximum(dense(h, w2, b2), 0.0)
    h = jnp.maximum(dense(h, w3, b3), 0.0)
    # Decoder: Linear + ReLU x2, then Linear + Sigmoid
    h = jnp.maximum(dense(h, w4, b4), 0.0)
    h = jnp.maximum(dense(h, w5, b5), 0.0)
    logits = dense(h, w6, b6)
    # sigmoid: exp on the EUP, approx reciprocal also on the EUP slot.
    out = pl.reciprocal(1.0 + jnp.exp(-logits), approx=True)
    o_ref[...] = out.astype(o_ref.dtype)


def init_params(key):
    """Deterministic init mimicking torch.nn.Linear's default
    (uniform in [-1/sqrt(fan_in), 1/sqrt(fan_in)]). Weights stored as [in, out]."""
    params = []
    for i in range(len(DIMS) - 1):
        fan_in, fan_out = DIMS[i], DIMS[i + 1]
        key, kw, kb = jax.random.split(key, 3)
        bound = 1.0 / (fan_in ** 0.5)
        w = jax.random.uniform(kw, (fan_in, fan_out), jnp.float32, -bound, bound)
        b = jax.random.uniform(kb, (fan_out,), jnp.float32, -bound, bound)
        params.append((w, b))
    return params


def prepare_params(params):
    """Zero-pad narrow hidden dims to lane-dense (128) widths and cast weights
    to bf16. Padding with zero rows/cols + zero bias is numerically exact."""
    flat = []
    for i, (w, b) in enumerate(params):
        in_p, out_p = PADDED_DIMS[i], PADDED_DIMS[i + 1]
        wp = jnp.zeros((in_p, out_p), jnp.float32).at[:w.shape[0], :w.shape[1]].set(w)
        bp = jnp.zeros((1, out_p), jnp.float32).at[0, :b.shape[0]].set(b)
        flat.append(wp.astype(jnp.bfloat16))
        flat.append(bp)  # bias kept f32 (added after f32 accumulation)
    return flat


@jax.jit
def ae_forward(x, *flat_params):
    """x: [B, 1, 28, 28] float32 -> [B, 1, 28, 28] float32."""
    B = x.shape[0]
    xf = x.reshape(B, 784)

    # Large batches use the full TILE_B; tiny demo batches use the smallest
    # sublane-aligned tile so we don't pad 2 rows up to 256.
    tile_b = TILE_B if B >= TILE_B else max(8, ((B + 7) // 8) * 8)
    Bp = ((B + tile_b - 1) // tile_b) * tile_b
    if Bp != B:
        # TODO(synk): for large ragged batches, handle the tail with a masked
        # final tile instead of materializing a padded HBM copy.
        xf = jnp.pad(xf, ((0, Bp - B), (0, 0)))

    args = [xf]
    in_specs = [pl.BlockSpec((tile_b, 784), lambda i: (i, 0))]
    # flat_params = (w1, b1, w2, b2, ...); weights [in, out] bf16, biases [1, out] f32.
    for p in flat_params:
        args.append(p)
        in_specs.append(pl.BlockSpec(p.shape, lambda i: (0, 0)))

    out = pl.pallas_call(
        ae_kernel,
        out_shape=jax.ShapeDtypeStruct((Bp, 784), x.dtype),
        grid=(Bp // tile_b,),
        in_specs=in_specs,
        out_specs=pl.BlockSpec((tile_b, 784), lambda i: (i, 0)),
        compiler_params=pltpu.CompilerParams(
            dimension_semantics=("parallel",)),
    )(*args)

    return out[:B].reshape(B, 1, 28, 28)


def ae_reference(x, params):
    """Pure-JAX f32 reference for correctness checking (unpadded params)."""
    B = x.shape[0]
    h = x.reshape(B, 784)
    for li, (w, b) in enumerate(params):
        h = h @ w + b
        if li < len(params) - 1:
            h = jnp.maximum(h, 0.0)
        else:
            h = jax.nn.sigmoid(h)
    return h.reshape(B, 1, 28, 28)


if __name__ == "__main__":
    key = jax.random.PRNGKey(0)
    kp, kx = jax.random.split(key)

    params = init_params(kp)
    flat_params = prepare_params(params)

    batch = 2
    x = jax.random.normal(kx, (batch, 1, 28, 28), jnp.float32)

    y = ae_forward(x, *flat_params)
    y = jax.block_until_ready(y)

    y_ref = ae_reference(x, params)
    assert y.shape == (batch, 1, 28, 28)
    # bf16 matmuls + approx reciprocal: allow ~1e-2 absolute deviation
    # (output is sigmoid-bounded in [0, 1]).
    max_err = float(jnp.max(jnp.abs(y - y_ref)))
    assert max_err < 3e-2, f"max abs err {max_err}"

    print("KERNEL_OK")
</pallas_src>

<mosaic_0001>
module attributes {stable_mosaic.version = 11 : i64} {
  func.func @ae_kernel(%arg0: i32, %arg1: memref<8x784xf32, #tpu.memory_space<vmem>>, %arg2: memref<784x256xbf16, #tpu.memory_space<vmem>>, %arg3: memref<1x256xf32, #tpu.memory_space<vmem>>, %arg4: memref<256x128xbf16, #tpu.memory_space<vmem>>, %arg5: memref<1x128xf32, #tpu.memory_space<vmem>>, %arg6: memref<128x128xbf16, #tpu.memory_space<vmem>>, %arg7: memref<1x128xf32, #tpu.memory_space<vmem>>, %arg8: memref<128x128xbf16, #tpu.memory_space<vmem>>, %arg9: memref<1x128xf32, #tpu.memory_space<vmem>>, %arg10: memref<128x256xbf16, #tpu.memory_space<vmem>>, %arg11: memref<1x256xf32, #tpu.memory_space<vmem>>, %arg12: memref<256x784xbf16, #tpu.memory_space<vmem>>, %arg13: memref<1x784xf32, #tpu.memory_space<vmem>>, %arg14: memref<8x784xf32, #tpu.memory_space<vmem>>) attributes {dimension_semantics = [#tpu.dimension_semantics<parallel>], iteration_bounds = array<i64: 1>, scalar_prefetch = 0 : i64, scratch_operands = 0 : i64, tpu.core_type = #tpu.core_type<tc>, window_params = [{transform_indices = @transform_0, window_bounds = array<i64: 8, 784>}, {pipeline_mode = #tpu.pipeline_mode<synchronous>, transform_indices = @transform_1, window_bounds = array<i64: 784, 256>}, {pipeline_mode = #tpu.pipeline_mode<synchronous>, transform_indices = @transform_2, window_bounds = array<i64: 1, 256>}, {pipeline_mode = #tpu.pipeline_mode<synchronous>, transform_indices = @transform_3, window_bounds = array<i64: 256, 128>}, {pipeline_mode = #tpu.pipeline_mode<synchronous>, transform_indices = @transform_4, window_bounds = array<i64: 1, 128>}, {pipeline_mode = #tpu.pipeline_mode<synchronous>, transform_indices = @transform_5, window_bounds = array<i64: 128, 128>}, {pipeline_mode = #tpu.pipeline_mode<synchronous>, transform_indices = @transform_6, window_bounds = array<i64: 1, 128>}, {pipeline_mode = #tpu.pipeline_mode<synchronous>, transform_indices = @transform_7, window_bounds = array<i64: 128, 128>}, {pipeline_mode = #tpu.pipeline_mode<synchronous>, transform_indices = @transform_8, window_bounds = array<i64: 1, 128>}, {pipeline_mode = #tpu.pipeline_mode<synchronous>, transform_indices = @transform_9, window_bounds = array<i64: 128, 256>}, {pipeline_mode = #tpu.pipeline_mode<synchronous>, transform_indices = @transform_10, window_bounds = array<i64: 1, 256>}, {pipeline_mode = #tpu.pipeline_mode<synchronous>, transform_indices = @transform_11, window_bounds = array<i64: 256, 784>}, {pipeline_mode = #tpu.pipeline_mode<synchronous>, transform_indices = @transform_12, window_bounds = array<i64: 1, 784>}, {transform_indices = @transform_13, window_bounds = array<i64: 8, 784>}]} {
    %c0 = arith.constant 0 : index
    %c0_0 = arith.constant 0 : index
    %0 = vector.load %arg1[%c0, %c0_0] : memref<8x784xf32, #tpu.memory_space<vmem>>, vector<8x784xf32>
    %1 = arith.truncf %0 : vector<8x784xf32> to vector<8x784xbf16>
    %c0_1 = arith.constant 0 : index
    %c0_2 = arith.constant 0 : index
    %2 = vector.load %arg2[%c0_1, %c0_2] : memref<784x256xbf16, #tpu.memory_space<vmem>>, vector<784x256xbf16>
    %cst = arith.constant dense<0.000000e+00> : vector<8x256xf32>
    %3 = tpu.matmul %1, %2, %cst {dimension_numbers = #tpu.dot_dimension_numbers<[1], [0], [0], [1], [0, 0, 1, 1], [], []>} : vector<8x784xbf16>, vector<784x256xbf16>, vector<8x256xf32> -> vector<8x256xf32>
    %c0_3 = arith.constant 0 : index
    %c0_4 = arith.constant 0 : index
    %4 = vector.load %arg3[%c0_3, %c0_4] : memref<1x256xf32, #tpu.memory_space<vmem>>, vector<1x256xf32>
    %5 = vector.broadcast %4 : vector<1x256xf32> to vector<8x256xf32>
    %6 = arith.addf %3, %5 : vector<8x256xf32>
    %cst_5 = arith.constant 0.000000e+00 : f32
    %7 = vector.broadcast %cst_5 : f32 to vector<8x256xf32>
    %8 = arith.maximumf %6, %7 : vector<8x256xf32>
    %9 = arith.truncf %8 : vector<8x256xf32> to vector<8x256xbf16>
    %c0_6 = arith.constant 0 : index
    %c0_7 = arith.constant 0 : index
    %10 = vector.load %arg4[%c0_6, %c0_7] : memref<256x128xbf16, #tpu.memory_space<vmem>>, vector<256x128xbf16>
    %cst_8 = arith.constant dense<0.000000e+00> : vector<8x128xf32>
    %11 = tpu.matmul %9, %10, %cst_8 {dimension_numbers = #tpu.dot_dimension_numbers<[1], [0], [0], [1], [0, 0, 1, 1], [], []>} : vector<8x256xbf16>, vector<256x128xbf16>, vector<8x128xf32> -> vector<8x128xf32>
    %c0_9 = arith.constant 0 : index
    %c0_10 = arith.constant 0 : index
    %12 = vector.load %arg5[%c0_9, %c0_10] : memref<1x128xf32, #tpu.memory_space<vmem>>, vector<1x128xf32>
    %13 = vector.broadcast %12 : vector<1x128xf32> to vector<8x128xf32>
    %14 = arith.addf %11, %13 : vector<8x128xf32>
    %cst_11 = arith.constant 0.000000e+00 : f32
    %15 = vector.broadcast %cst_11 : f32 to vector<8x128xf32>
    %16 = arith.maximumf %14, %15 : vector<8x128xf32>
    %17 = arith.truncf %16 : vector<8x128xf32> to vector<8x128xbf16>
    %c0_12 = arith.constant 0 : index
    %c0_13 = arith.constant 0 : index
    %18 = vector.load %arg6[%c0_12, %c0_13] : memref<128x128xbf16, #tpu.memory_space<vmem>>, vector<128x128xbf16>
    %cst_14 = arith.constant dense<0.000000e+00> : vector<8x128xf32>
    %19 = tpu.matmul %17, %18, %cst_14 {dimension_numbers = #tpu.dot_dimension_numbers<[1], [0], [0], [1], [0, 0, 1, 1], [], []>} : vector<8x128xbf16>, vector<128x128xbf16>, vector<8x128xf32> -> vector<8x128xf32>
    %c0_15 = arith.constant 0 : index
    %c0_16 = arith.constant 0 : index
    %20 = vector.load %arg7[%c0_15, %c0_16] : memref<1x128xf32, #tpu.memory_space<vmem>>, vector<1x128xf32>
    %21 = vector.broadcast %20 : vector<1x128xf32> to vector<8x128xf32>
    %22 = arith.addf %19, %21 : vector<8x128xf32>
    %cst_17 = arith.constant 0.000000e+00 : f32
    %23 = vector.broadcast %cst_17 : f32 to vector<8x128xf32>
    %24 = arith.maximumf %22, %23 : vector<8x128xf32>
    %25 = arith.truncf %24 : vector<8x128xf32> to vector<8x128xbf16>
    %c0_18 = arith.constant 0 : index
    %c0_19 = arith.constant 0 : index
    %26 = vector.load %arg8[%c0_18, %c0_19] : memref<128x128xbf16, #tpu.memory_space<vmem>>, vector<128x128xbf16>
    %cst_20 = arith.constant dense<0.000000e+00> : vector<8x128xf32>
    %27 = tpu.matmul %25, %26, %cst_20 {dimension_numbers = #tpu.dot_dimension_numbers<[1], [0], [0], [1], [0, 0, 1, 1], [], []>} : vector<8x128xbf16>, vector<128x128xbf16>, vector<8x128xf32> -> vector<8x128xf32>
    %c0_21 = arith.constant 0 : index
    %c0_22 = arith.constant 0 : index
    %28 = vector.load %arg9[%c0_21, %c0_22] : memref<1x128xf32, #tpu.memory_space<vmem>>, vector<1x128xf32>
    %29 = vector.broadcast %28 : vector<1x128xf32> to vector<8x128xf32>
    %30 = arith.addf %27, %29 : vector<8x128xf32>
    %cst_23 = arith.constant 0.000000e+00 : f32
    %31 = vector.broadcast %cst_23 : f32 to vector<8x128xf32>
    %32 = arith.maximumf %30, %31 : vector<8x128xf32>
    %33 = arith.truncf %32 : vector<8x128xf32> to vector<8x128xbf16>
    %c0_24 = arith.constant 0 : index
    %c0_25 = arith.constant 0 : index
    %34 = vector.load %arg10[%c0_24, %c0_25] : memref<128x256xbf16, #tpu.memory_space<vmem>>, vector<128x256xbf16>
    %cst_26 = arith.constant dense<0.000000e+00> : vector<8x256xf32>
    %35 = tpu.matmul %33, %34, %cst_26 {dimension_numbers = #tpu.dot_dimension_numbers<[1], [0], [0], [1], [0, 0, 1, 1], [], []>} : vector<8x128xbf16>, vector<128x256xbf16>, vector<8x256xf32> -> vector<8x256xf32>
    %c0_27 = arith.constant 0 : index
    %c0_28 = arith.constant 0 : index
    %36 = vector.load %arg11[%c0_27, %c0_28] : memref<1x256xf32, #tpu.memory_space<vmem>>, vector<1x256xf32>
    %37 = vector.broadcast %36 : vector<1x256xf32> to vector<8x256xf32>
    %38 = arith.addf %35, %37 : vector<8x256xf32>
    %cst_29 = arith.constant 0.000000e+00 : f32
    %39 = vector.broadcast %cst_29 : f32 to vector<8x256xf32>
    %40 = arith.maximumf %38, %39 : vector<8x256xf32>
    %41 = arith.truncf %40 : vector<8x256xf32> to vector<8x256xbf16>
    %c0_30 = arith.constant 0 : index
    %c0_31 = arith.constant 0 : index
    %42 = vector.load %arg12[%c0_30, %c0_31] : memref<256x784xbf16, #tpu.memory_space<vmem>>, vector<256x784xbf16>
    %cst_32 = arith.constant dense<0.000000e+00> : vector<8x784xf32>
    %43 = tpu.matmul %41, %42, %cst_32 {dimension_numbers = #tpu.dot_dimension_numbers<[1], [0], [0], [1], [0, 0, 1, 1], [], []>} : vector<8x256xbf16>, vector<256x784xbf16>, vector<8x784xf32> -> vector<8x784xf32>
    %c0_33 = arith.constant 0 : index
    %c0_34 = arith.constant 0 : index
    %44 = vector.load %arg13[%c0_33, %c0_34] : memref<1x784xf32, #tpu.memory_space<vmem>>, vector<1x784xf32>
    %45 = vector.broadcast %44 : vector<1x784xf32> to vector<8x784xf32>
    %46 = arith.addf %43, %45 : vector<8x784xf32>
    %cst_35 = arith.constant 0.000000e+00 : f32
    %47 = vector.broadcast %cst_35 : f32 to vector<8x784xf32>
    %48 = arith.subf %47, %46 : vector<8x784xf32>
    %49 = math.exp %48 : vector<8x784xf32>
    %cst_36 = arith.constant 1.000000e+00 : f32
    %50 = vector.broadcast %cst_36 : f32 to vector<8x784xf32>
    %51 = arith.addf %50, %49 : vector<8x784xf32>
    %52 = tpu.reciprocal %51 {approx = true} : vector<8x784xf32> -> vector<8x784xf32>
    %c0_37 = arith.constant 0 : index
    %c0_38 = arith.constant 0 : index
    %53 = vector.load %arg14[%c0_37, %c0_38] : memref<8x784xf32, #tpu.memory_space<vmem>>, vector<8x784xf32>
    tpu.vector_store %arg14[%c0_37, %c0_38], %52 {strides = array<i32>} : memref<8x784xf32, #tpu.memory_space<vmem>>, vector<8x784xf32>,
    return
  }
  func.func @transform_0(%arg0: i32) -> (i32, i32) {
    %c0_i32 = arith.constant 0 : i32
    %c0_i32_0 = arith.constant 0 : i32
    return %arg0, %c0_i32 : i32, i32
  }
  func.func @transform_1(%arg0: i32) -> (i32, i32) {
    %c0_i32 = arith.constant 0 : i32
    %c0_i32_0 = arith.constant 0 : i32
    %c0_i32_1 = arith.constant 0 : i32
    return %c0_i32, %c0_i32_0 : i32, i32
  }
  func.func @transform_2(%arg0: i32) -> (i32, i32) {
    %c0_i32 = arith.constant 0 : i32
    %c0_i32_0 = arith.constant 0 : i32
    %c0_i32_1 = arith.constant 0 : i32
    return %c0_i32, %c0_i32_0 : i32, i32
  }
  func.func @transform_3(%arg0: i32) -> (i32, i32) {
    %c0_i32 = arith.constant 0 : i32
    %c0_i32_0 = arith.constant 0 : i32
    %c0_i32_1 = arith.constant 0 : i32
    return %c0_i32, %c0_i32_0 : i32, i32
  }
  func.func @transform_4(%arg0: i32) -> (i32, i32) {
    %c0_i32 = arith.constant 0 : i32
    %c0_i32_0 = arith.constant 0 : i32
    %c0_i32_1 = arith.constant 0 : i32
    return %c0_i32, %c0_i32_0 : i32, i32
  }
  func.func @transform_5(%arg0: i32) -> (i32, i32) {
    %c0_i32 = arith.constant 0 : i32
    %c0_i32_0 = arith.constant 0 : i32
    %c0_i32_1 = arith.constant 0 : i32
    return %c0_i32, %c0_i32_0 : i32, i32
  }
  func.func @transform_6(%arg0: i32) -> (i32, i32) {
    %c0_i32 = arith.constant 0 : i32
    %c0_i32_0 = arith.constant 0 : i32
    %c0_i32_1 = arith.constant 0 : i32
    return %c0_i32, %c0_i32_0 : i32, i32
  }
  func.func @transform_7(%arg0: i32) -> (i32, i32) {
    %c0_i32 = arith.constant 0 : i32
    %c0_i32_0 = arith.constant 0 : i32
    %c0_i32_1 = arith.constant 0 : i32
    return %c0_i32, %c0_i32_0 : i32, i32
  }
  func.func @transform_8(%arg0: i32) -> (i32, i32) {
    %c0_i32 = arith.constant 0 : i32
    %c0_i32_0 = arith.constant 0 : i32
    %c0_i32_1 = arith.constant 0 : i32
    return %c0_i32, %c0_i32_0 : i32, i32
  }
  func.func @transform_9(%arg0: i32) -> (i32, i32) {
    %c0_i32 = arith.constant 0 : i32
    %c0_i32_0 = arith.constant 0 : i32
    %c0_i32_1 = arith.constant 0 : i32
    return %c0_i32, %c0_i32_0 : i32, i32
  }
  func.func @transform_10(%arg0: i32) -> (i32, i32) {
    %c0_i32 = arith.constant 0 : i32
    %c0_i32_0 = arith.constant 0 : i32
    %c0_i32_1 = arith.constant 0 : i32
    return %c0_i32, %c0_i32_0 : i32, i32
  }
  func.func @transform_11(%arg0: i32) -> (i32, i32) {
    %c0_i32 = arith.constant 0 : i32
    %c0_i32_0 = arith.constant 0 : i32
    %c0_i32_1 = arith.constant 0 : i32
    return %c0_i32, %c0_i32_0 : i32, i32
  }
  func.func @transform_12(%arg0: i32) -> (i32, i32) {
    %c0_i32 = arith.constant 0 : i32
    %c0_i32_0 = arith.constant 0 : i32
    %c0_i32_1 = arith.constant 0 : i32
    return %c0_i32, %c0_i32_0 : i32, i32
  }
  func.func @transform_13(%arg0: i32) -> (i32, i32) {
    %c0_i32 = arith.constant 0 : i32
    %c0_i32_0 = arith.constant 0 : i32
    return %arg0, %c0_i32 : i32, i32
  }
}

</mosaic_0001>

<bundles_post_ra>
// kernel: ae_forward.1
= control target key start
LH: loop header
LB: loop body
LE: loop exit
PB: predicated region body
PF: predicated region fallthrough
CT: control target
= control target key end

     0   :  { %vm659_vm0 = vcmask 130048   ;;  %vm3111_vm1 = vmmov 0   ;;  %s4080_s1 = inlined_call_operand.vmem [shape: bf16[784,256], index: 1, kind: input, shape index: {}]   ;;  %s4081_s0 = inlined_call_operand.vmem [shape: f32[8,784], index: 0, kind: input, shape index: {}]   ;;  %s4082_s3 = inlined_call_operand.vmem [shape: bf16[256,128], index: 3, kind: input, shape index: {}]   ;;  %s4083_s5 = inlined_call_operand.vmem [shape: bf16[128,128], index: 5, kind: input, shape index: {}]   ;;  %s4084_s2 = inlined_call_operand.vmem [shape: f32[1,256], index: 2, kind: input, shape index: {}]   ;;  %s4085_s7 = inlined_call_operand.vmem [shape: bf16[128,128], index: 7, kind: input, shape index: {}]   ;;  %s4086_s4 = inlined_call_operand.vmem [shape: f32[1,128], index: 4, kind: input, shape index: {}]   ;;  %s4087_s9 = inlined_call_operand.vmem [shape: bf16[128,256], index: 9, kind: input, shape index: {}]   ;;  %s4088_s6 = inlined_call_operand.vmem [shape: f32[1,128], index: 6, kind: input, shape index: {}]   ;;  %s4089_s11 = inlined_call_operand.vmem [shape: bf16[256,784], index: 11, kind: input, shape index: {}]   ;;  %s4090_s8 = inlined_call_operand.vmem [shape: f32[1,128], index: 8, kind: input, shape index: {}]   ;;  %s4091_s10 = inlined_call_operand.vmem [shape: f32[1,256], index: 10, kind: input, shape index: {}]   ;;  %s4092_s12 = inlined_call_operand.vmem [shape: f32[1,784], index: 12, kind: input, shape index: {}]   ;;  %s4093_s13 = inlined_call_operand.vmem [shape: f32[8,784], index: 13, kind: output, shape index: {}]  }
   0x1   :  { %v2718_v0 = vld [vmem:[%s4080_s1 + $0x4] ss:$8 sps:$4 sm:$0xff]   ;;  %v2720_v1 = vld [vmem:[%s4080_s1] ss:$8 sps:$4 sm:$0xff]   ;;  %v2721_v2 = vld [vmem:[%s4080_s1 + $0x14] ss:$8 sps:$4 sm:$0xff]  }
   0x2   :  { %663 = vmatprep.subr.bf16.mxu0 %v2718_v0  ;;  %v2723_v3 = vld [vmem:[%s4080_s1 + $0x10] ss:$8 sps:$4 sm:$0xff]   ;;  %v2724_v4 = vld [vmem:[%s4080_s1 + $0x24] ss:$8 sps:$4 sm:$0xff]   ;;  %v2726_v5 = vld [vmem:[%s4080_s1 + $0x20] ss:$8 sps:$4 sm:$0xff]  }
   0x3   :  { %664 = vmatpush1.bf16.msra.mxu0 %v2720_v1  ;;  %v2727_v6 = vld [vmem:[%s4080_s1 + $0x34] ss:$8 sps:$4 sm:$0xff]   ;;  %v2729_v7 = vld [vmem:[%s4080_s1 + $0x30] ss:$8 sps:$4 sm:$0xff]   ;;  %v2730_v8 = vld [vmem:[%s4080_s1 + $0x44] ss:$8 sps:$4 sm:$0xff]  }
   0x4   :  { %665 = vmatprep.subr.bf16.mxu0 %v2721_v2  ;;  %v2732_v9 = vld [vmem:[%s4080_s1 + $0x40] ss:$8 sps:$4 sm:$0xff]   ;;  %v2733_v10 = vld [vmem:[%s4080_s1 + $0x54] ss:$8 sps:$4 sm:$0xff]   ;;  %v2735_v11 = vld [vmem:[%s4080_s1 + $0x50] ss:$8 sps:$4 sm:$0xff]  }
   0x5   :  { %v2736_v12 = vld [vmem:[%s4080_s1 + $0x64] ss:$8 sps:$4 sm:$0xff]   ;;  %v2738_v15 = vld [vmem:[%s4080_s1 + $0x60] ss:$8 sps:$4 sm:$0xff]   ;;  %v2739_v16 = vld [vmem:[%s4080_s1 + $0x74] ss:$8 sps:$4 sm:$0xff]  }
   0x6   :  { %v46_v13 = vld [vmem:[%s4081_s0 + $0x8] sm:$0xff]  ;;  %v2741_v17 = vld [vmem:[%s4080_s1 + $0x70] ss:$8 sps:$4 sm:$0xff]   ;;  %v2745_v20 = vld [vmem:[%s4080_s1 + $0x94] ss:$8 sps:$4 sm:$0xff]  }
   0x7   :  { %666 = vmatpush1.bf16.msra.mxu0 %v2723_v3  ;;  %v53_v14 = vpack.c.bf16 %v46_v13, %v46_v13  ;;  %v2742_v18 = vld [vmem:[%s4080_s1 + $0x84] ss:$8 sps:$4 sm:$0xff]   ;;  %v2744_v19 = vld [vmem:[%s4080_s1 + $0x80] ss:$8 sps:$4 sm:$0xff]   ;;  %v2747_v21 = vld [vmem:[%s4080_s1 + $0x90] ss:$8 sps:$4 sm:$0xff]  }
   0x8   :  { %667 = vmatprep.subr.bf16.mxu0 %v2724_v4  ;;  %v2748_v22 = vld [vmem:[%s4080_s1 + $0xa4] ss:$8 sps:$4 sm:$0xff]   ;;  %v2750_v23 = vld [vmem:[%s4080_s1 + $0xa0] ss:$8 sps:$4 sm:$0xff]   ;;  %v2751_v24 = vld [vmem:[%s4080_s1 + $0xb4] ss:$8 sps:$4 sm:$0xff]  }
   0x9   :  { %695 = vmatprep.mubr.bf16.mxu0 %v53_v14  ;;  %v2753_v25 = vld [vmem:[%s4080_s1 + $0xb0] ss:$8 sps:$4 sm:$0xff]   ;;  %v2754_v26 = vld [vmem:[%s4080_s1 + $0xc4] ss:$8 sps:$4 sm:$0xff]   ;;  %v2756_v27 = vld [vmem:[%s4080_s1 + $0xc0] ss:$8 sps:$4 sm:$0xff]  }
   0xa   :  { %v2757_v28 = vld [vmem:[%s4080_s1 + $0xd4] ss:$8 sps:$4 sm:$0xff]   ;;  %v2759_v29 = vld [vmem:[%s4080_s1 + $0xd0] ss:$8 sps:$4 sm:$0xff]   ;;  %v2760_v30 = vld [vmem:[%s4080_s1 + $0xe4] ss:$8 sps:$4 sm:$0xff]  }
   0xb   :  { %668 = vmatpush1.bf16.msra.mxu0 %v2726_v5  ;;  %v2762_v31 = vld [vmem:[%s4080_s1 + $0xe0] ss:$8 sps:$4 sm:$0xff]   ;;  %v2763_v32 = vld [vmem:[%s4080_s1 + $0xf4] ss:$8 sps:$4 sm:$0xff]   ;;  %v2765_v33 = vld [vmem:[%s4080_s1 + $0xf0] ss:$8 sps:$4 sm:$0xff]  }
   0xc   :  { %669 = vmatprep.subr.bf16.mxu0 %v2727_v6  ;;  %v2768_v34 = vld [vmem:[%s4080_s1 + $0x104] ss:$8 sps:$4 sm:$0xff]   ;;  %v48_v36 = vld [vmem:[%s4081_s0 + $0x18] sm:$0xff]  ;;  %v2766_v38 = vld [vmem:[%s4080_s1 + $0x100] ss:$8 sps:$4 sm:$0xff]  }
   0xd   :  { %v45_v35 = vld [vmem:[%s4081_s0] sm:$0xff]  ;;  %v55_v39 = vpack.c.bf16 %v48_v36, %v48_v36  ;;  %v2771_v40 = vld [vmem:[%s4080_s1 + $0x114] ss:$8 sps:$4 sm:$0xff]   ;;  %v2769_v41 = vld [vmem:[%s4080_s1 + $0x110] ss:$8 sps:$4 sm:$0xff]  }
   0xe   :  { %v52_v37 = vpack.c.bf16 %v45_v35, %v45_v35  ;;  %v2774_v42 = vld [vmem:[%s4080_s1 + $0x124] ss:$8 sps:$4 sm:$0xff]   ;;  %v2772_v43 = vld [vmem:[%s4080_s1 + $0x120] ss:$8 sps:$4 sm:$0xff]   ;;  %v2777_v44 = vld [vmem:[%s4080_s1 + $0x134] ss:$8 sps:$4 sm:$0xff]  }
   0xf   :  { %670 = vmatpush1.bf16.msra.mxu0 %v2729_v7  ;;  %v2775_v45 = vld [vmem:[%s4080_s1 + $0x130] ss:$8 sps:$4 sm:$0xff]   ;;  %v2780_v46 = vld [vmem:[%s4080_s1 + $0x144] ss:$8 sps:$4 sm:$0xff]   ;;  %v2778_v47 = vld [vmem:[%s4080_s1 + $0x140] ss:$8 sps:$4 sm:$0xff]  }
  0x10   :  { %671 = vmatprep.subr.bf16.mxu0 %v2730_v8  ;;  %v2783_v48 = vld [vmem:[%s4080_s1 + $0x154] ss:$8 sps:$4 sm:$0xff]   ;;  %v2865_v49 = vld [vmem:[%s4082_s3 + $0x40] sm:$0xff]   ;;  %v2781_v51 = vld [vmem:[%s4080_s1 + $0x150] ss:$8 sps:$4 sm:$0xff]  }
  0x11   :  { %v2866_v50 = vld [vmem:[%s4082_s3] sm:$0xff]   ;;  %2599 = vmatprep.subr.bf16.mxu1 %v2865_v49  ;;  %v2867_v52 = vld [vmem:[%s4082_s3 + $0x48] sm:$0xff]   ;;  %v2869_v54 = vld [vmem:[%s4082_s3 + $0x50] sm:$0xff]  }
  0x12   :  { %2600 = vmatpush3.bf16.msra.mxu1 %v2866_v50  ;;  %v2868_v53 = vld [vmem:[%s4082_s3 + $0x8] sm:$0xff]   ;;  %v2870_v57 = vld [vmem:[%s4082_s3 + $0x10] sm:$0xff]   ;;  %v2871_v58 = vld [vmem:[%s4082_s3 + $0x58] sm:$0xff]  }
  0x13   :  { %672 = vmatpush1.bf16.msra.mxu0 %v2732_v9  ;;  %2601 = vmatprep.subr.bf16.mxu1 %v2867_v52  ;;  %v2786_v55 = vld [vmem:[%s4080_s1 + $0x164] ss:$8 sps:$4 sm:$0xff]   ;;  %v2784_v56 = vld [vmem:[%s4080_s1 + $0x160] ss:$8 sps:$4 sm:$0xff]   ;;  %v2789_v59 = vld [vmem:[%s4080_s1 + $0x174] ss:$8 sps:$4 sm:$0xff]  }
  0x14   :  { %673 = vmatprep.subr.bf16.mxu0 %v2733_v10  ;;  %v2787_v60 = vld [vmem:[%s4080_s1 + $0x170] ss:$8 sps:$4 sm:$0xff]   ;;  %v2792_v61 = vld [vmem:[%s4080_s1 + $0x184] ss:$8 sps:$4 sm:$0xff]   ;;  %v2790_v1 = vld [vmem:[%s4080_s1 + $0x180] ss:$8 sps:$4 sm:$0xff]  }
  0x15   :  { %v2872_v62 = vld [vmem:[%s4082_s3 + $0x18] sm:$0xff]   ;;  %v2873_v63 = vld [vmem:[%s4082_s3 + $0x60] sm:$0xff]   ;;  %v2875_v2 = vld [vmem:[%s4082_s3 + $0x68] sm:$0xff]  }
  0x16   :  { %2602 = vmatpush3.bf16.msra.mxu1 %v2868_v53  ;;  %v2874_v0 = vld [vmem:[%s4082_s3 + $0x20] sm:$0xff]   ;;  %v2795_v3 = vld [vmem:[%s4080_s1 + $0x194] ss:$8 sps:$4 sm:$0xff]   ;;  %v2876_v4 = vld [vmem:[%s4082_s3 + $0x28] sm:$0xff]  }
  0x17   :  { %674 = vmatpush1.bf16.msra.mxu0 %v2735_v11  ;;  %2603 = vmatprep.subr.bf16.mxu1 %v2869_v54  ;;  %v2793_v5 = vld [vmem:[%s4080_s1 + $0x190] ss:$8 sps:$4 sm:$0xff]   ;;  %v2798_v6 = vld [vmem:[%s4080_s1 + $0x1a4] ss:$8 sps:$4 sm:$0xff]   ;;  %v2796_v7 = vld [vmem:[%s4080_s1 + $0x1a0] ss:$8 sps:$4 sm:$0xff]  }
  0x18   :  { %675 = vmatprep.subr.bf16.mxu0 %v2736_v12  ;;  %v2801_v8 = vld [vmem:[%s4080_s1 + $0x1b4] ss:$8 sps:$4 sm:$0xff]   ;;  %v2799_v9 = vld [vmem:[%s4080_s1 + $0x1b0] ss:$8 sps:$4 sm:$0xff]   ;;  %v2804_v10 = vld [vmem:[%s4080_s1 + $0x1c4] ss:$8 sps:$4 sm:$0xff]  }
  0x19   :  { %v2802_v11 = vld [vmem:[%s4080_s1 + $0x1c0] ss:$8 sps:$4 sm:$0xff]   ;;  %v2807_v12 = vld [vmem:[%s4080_s1 + $0x1d4] ss:$8 sps:$4 sm:$0xff]   ;;  %v2805_v13 = vld [vmem:[%s4080_s1 + $0x1d0] ss:$8 sps:$4 sm:$0xff]  }
  0x1a   :  { %2604 = vmatpush3.bf16.msra.mxu1 %v2870_v57  ;;  %v2810_v14 = vld [vmem:[%s4080_s1 + $0x1e4] ss:$8 sps:$4 sm:$0xff]   ;;  %v2832_v35 = vld [vmem:[%s4080_s1 + $0x260] ss:$8 sps:$4 sm:$0xff]   ;;  %v2837_v36 = vld [vmem:[%s4080_s1 + $0x274] ss:$8 sps:$4 sm:$0xff]  }
  0x1b   :  { %676 = vmatpush1.bf16.msra.mxu0 %v2738_v15  ;;  %2605 = vmatprep.subr.bf16.mxu1 %v2871_v58  ;;  %v2808_v15 = vld [vmem:[%s4080_s1 + $0x1e0] ss:$8 sps:$4 sm:$0xff]   ;;  %v2853_v49 = vld [vmem:[%s4080_s1 + $0x2d0] ss:$8 sps:$4 sm:$0xff]   ;;  %v2858_v50 = vld [vmem:[%s4080_s1 + $0x2e4] ss:$8 sps:$4 sm:$0xff]  }
  0x1c   :  { %677 = vmatprep.subr.bf16.mxu0 %v2739_v16  ;;  %v2813_v16 = vld [vmem:[%s4080_s1 + $0x1f4] ss:$8 sps:$4 sm:$0xff]   ;;  %v2859_v53 = vld [vmem:[%s4080_s1 + $0x2f0] ss:$8 sps:$4 sm:$0xff]   ;;  %v49_v54 = vld [vmem:[%s4081_s0 + $0x20] sm:$0xff]  ;;  %v3109_v58 = vmov 0  }
  0x1d   :  { %v2861_v52 = vld [vmem:[%s4080_s1 + $0x2f4] ss:$8 sps:$4 sm:$0xff]   ;;  %v2862_v57 = vld [vmem:[%s4080_s1 + $0x300] ss:$8 sps:$4 sm:$0xff]  }
  0x1e   :  { %2606 = vmatpush3.bf16.msra.mxu1 %v2872_v62  ;;  %v2878_v62 = vld [vmem:[%s4082_s3 + $0x30] sm:$0xff]  }
  0x1f   :  { %678 = vmatpush1.bf16.msra.mxu0 %v2741_v17  ;;  %2607 = vmatprep.subr.bf16.mxu1 %v2873_v63  ;;  %v2811_v17 = vld [vmem:[%s4080_s1 + $0x1f0] ss:$8 sps:$4 sm:$0xff]  }
  0x20   :  { %679 = vmatprep.subr.bf16.mxu0 %v2742_v18  ;;  %v47_v18 = vld [vmem:[%s4081_s0 + $0x10] sm:$0xff]  ;;  %v2879_v63 = vld [vmem:[%s4082_s3 + $0x78] sm:$0xff]  }
  0x22   :  { %2608 = vmatpush3.bf16.msra.mxu1 %v2874_v0  ;;  %v2880_v0 = vld [vmem:[%s4082_s3 + $0x38] sm:$0xff]  }
  0x23   :  { %680 = vmatpush1.bf16.msra.mxu0 %v2744_v19  ;;  %2609 = vmatprep.subr.bf16.mxu1 %v2875_v2  ;;  %v2816_v19 = vld [vmem:[%s4080_s1 + $0x204] ss:$8 sps:$4 sm:$0xff]   ;;  %v159_v2 = vlaneseq }
  0x24   :  { %681 = vmatprep.subr.bf16.mxu0 %v2745_v20  ;;  %v50_v20 = vld [vmem:[%s4081_s0 + $0x28] sm:$0xff] }
  0x26   :  { %2610 = vmatpush3.bf16.msra.mxu1 %v2876_v4 }
  0x27   :  { %682 = vmatpush1.bf16.msra.mxu0 %v2747_v21  ;;  %v54_v21 = vpack.c.bf16 %v47_v18, %v47_v18  ;;  %v2881_v18 = vld [vmem:[%s4083_s5] sm:$0xff]  }
  0x28   :  { %683 = vmatprep.subr.bf16.mxu0 %v2748_v22  ;;  %v2814_v22 = vld [vmem:[%s4080_s1 + $0x200] ss:$8 sps:$4 sm:$0xff]  }
  0x2b   :  { %684 = vmatpush1.bf16.msra.mxu0 %v2750_v23  ;;  %v57_v23 = vpack.c.bf16 %v50_v20, %v50_v20  ;;  %v2882_v20 = vld [vmem:[%s4083_s5 + $0x8] sm:$0xff]  }
  0x2c   :  { %685 = vmatprep.subr.bf16.mxu0 %v2751_v24  ;;  %v2819_v24 = vld [vmem:[%s4080_s1 + $0x214] ss:$8 sps:$4 sm:$0xff]  }
  0x2f   :  { %686 = vmatpush1.bf16.msra.mxu0 %v2753_v25  ;;  %v2817_v25 = vld [vmem:[%s4080_s1 + $0x210] ss:$8 sps:$4 sm:$0xff]  }
  0x30   :  { %687 = vmatprep.subr.bf16.mxu0 %v2754_v26  ;;  %v2822_v26 = vld [vmem:[%s4080_s1 + $0x224] ss:$8 sps:$4 sm:$0xff]  }
  0x33   :  { %688 = vmatpush1.bf16.msra.mxu0 %v2756_v27  ;;  %v2820_v27 = vld [vmem:[%s4080_s1 + $0x220] ss:$8 sps:$4 sm:$0xff]  }
  0x34   :  { %689 = vmatprep.subr.bf16.mxu0 %v2757_v28  ;;  %v2825_v28 = vld [vmem:[%s4080_s1 + $0x234] ss:$8 sps:$4 sm:$0xff]  }
  0x37   :  { %690 = vmatpush1.bf16.msra.mxu0 %v2759_v29  ;;  %v2823_v29 = vld [vmem:[%s4080_s1 + $0x230] ss:$8 sps:$4 sm:$0xff]  }
  0x38   :  { %691 = vmatprep.subr.bf16.mxu0 %v2760_v30  ;;  %v2828_v30 = vld [vmem:[%s4080_s1 + $0x244] ss:$8 sps:$4 sm:$0xff]  }
  0x3b   :  { %692 = vmatpush1.bf16.msra.mxu0 %v2762_v31  ;;  %v2826_v31 = vld [vmem:[%s4080_s1 + $0x240] ss:$8 sps:$4 sm:$0xff]  }
  0x3c   :  { %693 = vmatprep.subr.bf16.mxu0 %v2763_v32  ;;  %v2831_v32 = vld [vmem:[%s4080_s1 + $0x254] ss:$8 sps:$4 sm:$0xff]  }
  0x3f   :  { %694 = vmatpush1.bf16.msra.mxu0 %v2765_v33  ;;  %v2829_v33 = vld [vmem:[%s4080_s1 + $0x250] ss:$8 sps:$4 sm:$0xff]  }
  0x40   :  { %704 = vmatprep.subr.bf16.mxu0 %v2768_v34  ;;  %v2834_v34 = vld [vmem:[%s4080_s1 + $0x264] ss:$8 sps:$4 sm:$0xff]  }
  0x42   :  { %696 = vmatmul.mubr.bf16.vlgmr.msra.gmra.mrb[0].mxu0 %v52_v37  ;;  %v2835_v37 = vld [vmem:[%s4080_s1 + $0x270] ss:$8 sps:$4 sm:$0xff]  }
  0x43   :  { %705 = vmatpush1.bf16.msra.mxu0 %v2766_v38  ;;  %736 = vmatprep.mubr.bf16.mxu0 %v55_v39  ;;  %v2840_v38 = vld [vmem:[%s4080_s1 + $0x284] ss:$8 sps:$4 sm:$0xff]   ;;  %v2838_v39 = vld [vmem:[%s4080_s1 + $0x280] ss:$8 sps:$4 sm:$0xff]  }
  0x44   :  { %706 = vmatprep.subr.bf16.mxu0 %v2771_v40  ;;  %v2843_v40 = vld [vmem:[%s4080_s1 + $0x294] ss:$8 sps:$4 sm:$0xff]  }
  0x47   :  { %707 = vmatpush1.bf16.msra.mxu0 %v2769_v41  ;;  %v2841_v41 = vld [vmem:[%s4080_s1 + $0x290] ss:$8 sps:$4 sm:$0xff]  }
  0x48   :  { %708 = vmatprep.subr.bf16.mxu0 %v2774_v42  ;;  %v2846_v42 = vld [vmem:[%s4080_s1 + $0x2a4] ss:$8 sps:$4 sm:$0xff]  }
  0x4b   :  { %709 = vmatpush1.bf16.msra.mxu0 %v2772_v43  ;;  %v2844_v43 = vld [vmem:[%s4080_s1 + $0x2a0] ss:$8 sps:$4 sm:$0xff]  }
  0x4c   :  { %710 = vmatprep.subr.bf16.mxu0 %v2777_v44  ;;  %v2849_v44 = vld [vmem:[%s4080_s1 + $0x2b4] ss:$8 sps:$4 sm:$0xff]  }
  0x4f   :  { %711 = vmatpush1.bf16.msra.mxu0 %v2775_v45  ;;  %v2847_v45 = vld [vmem:[%s4080_s1 + $0x2b0] ss:$8 sps:$4 sm:$0xff]  }
  0x50   :  { %712 = vmatprep.subr.bf16.mxu0 %v2780_v46  ;;  %v2852_v46 = vld [vmem:[%s4080_s1 + $0x2c4] ss:$8 sps:$4 sm:$0xff]  }
  0x53   :  { %713 = vmatpush1.bf16.msra.mxu0 %v2778_v47  ;;  %v2850_v47 = vld [vmem:[%s4080_s1 + $0x2c0] ss:$8 sps:$4 sm:$0xff]  }
  0x54   :  { %714 = vmatprep.subr.bf16.mxu0 %v2783_v48  ;;  %v2855_v48 = vld [vmem:[%s4080_s1 + $0x2d4] ss:$8 sps:$4 sm:$0xff]  }
  0x57   :  { %715 = vmatpush1.bf16.msra.mxu0 %v2781_v51  ;;  %v2856_v51 = vld [vmem:[%s4080_s1 + $0x2e0] ss:$8 sps:$4 sm:$0xff]  }
  0x58   :  { %716 = vmatprep.subr.bf16.mxu0 %v2786_v55  ;;  %v2864_v55 = vld [vmem:[%s4080_s1 + $0x304] ss:$8 sps:$4 sm:$0xff]  }
  0x5b   :  { %717 = vmatpush1.bf16.msra.mxu0 %v2784_v56  ;;  %v56_v56 = vpack.c.bf16 %v49_v54, %v49_v54  ;;  %v2902_v54 = vld [vmem:[%s4087_s9 + $0x14] ss:$8 sps:$4 sm:$0xff]  }
  0x5c   :  { %718 = vmatprep.subr.bf16.mxu0 %v2789_v59  ;;  %v51_v59 = vld [vmem:[%s4081_s0 + $0x30] sm:$0xff] }
  0x5f   :  { %719 = vmatpush1.bf16.msra.mxu0 %v2787_v60  ;;  %v58_v60 = vpack.c.bf16 %v51_v59, %v51_v59  ;;  %v2908_v59 = vld [vmem:[%s4087_s9 + $0x34] ss:$8 sps:$4 sm:$0xff]  }
  0x60   :  { %720 = vmatprep.subr.bf16.mxu0 %v2792_v61  ;;  %v2877_v61 = vld [vmem:[%s4082_s3 + $0x70] sm:$0xff]  }
  0x61   :  { %2611 = vmatprep.subr.bf16.mxu1 %v2877_v61  ;;  %v2909_v61 = vld [vmem:[%s4087_s9 + $0x40] ss:$8 sps:$4 sm:$0xff]  }
  0x62   :  { %2612 = vmatpush3.bf16.msra.mxu1 %v2878_v62  ;;  %v2914_v62 = vld [vmem:[%s4087_s9 + $0x54] ss:$8 sps:$4 sm:$0xff]  }
  0x63   :  { %721 = vmatpush1.bf16.msra.mxu0 %v2790_v1  ;;  %2613 = vmatprep.subr.bf16.mxu1 %v2879_v63  ;;  %v3110_v1 = vmov 0.0   ;;  %v2912_v63 = vld [vmem:[%s4087_s9 + $0x50] ss:$8 sps:$4 sm:$0xff]  }
  0x64   :  { %722 = vmatprep.subr.bf16.mxu0 %v2795_v3  ;;  %v3548_v3 = vshrl.u32 %v159_v2, 7  ;;  %v2920_v2 = vld [vmem:[%s4087_s9 + $0x74] ss:$8 sps:$4 sm:$0xff]  }
  0x66   :  { %2614 = vmatpush3.bf16.msra.mxu1 %v2880_v0  ;;  %v3551_v4 = vsub.s32 0, %v3548_v3  ;;  %v2917_v0 = vld [vmem:[%s4087_s9 + $0x64] ss:$8 sps:$4 sm:$0xff]  }
  0x67   :  { %723 = vmatpush1.bf16.msra.mxu0 %v2793_v5  ;;  %2661 = vmatprep.subr.bf16.mxu1 %v3110_v1  ;;  %v157_v5 = vld [vmem:[%s4084_s2] sm:$0x3] }
  0x68   :  { %724 = vmatprep.subr.bf16.mxu0 %v2798_v6  ;;  %v3557_v6 = vsub.s32 1, %v3548_v3 }
  0x6b   :  { %725 = vmatpush1.bf16.msra.mxu0 %v2796_v7  ;;  %v162_v7 = vrot.slane %v157_v5, %v3551_v4 }
  0x6c   :  { %726 = vmatprep.subr.bf16.mxu0 %v2801_v8  ;;  %v166_v8 = vrot.slane %v157_v5, %v3557_v6  ;;  %v2918_v5 = vld [vmem:[%s4087_s9 + $0x70] ss:$8 sps:$4 sm:$0xff]  }
  0x6f   :  { %727 = vmatpush1.bf16.msra.mxu0 %v2799_v9 }
  0x70   :  { %728 = vmatprep.subr.bf16.mxu0 %v2804_v10 }
  0x73   :  { %729 = vmatpush1.bf16.msra.mxu0 %v2802_v11 }
  0x74   :  { %730 = vmatprep.subr.bf16.mxu0 %v2807_v12 }
  0x77   :  { %731 = vmatpush1.bf16.msra.mxu0 %v2805_v13 }
  0x78   :  { %732 = vmatprep.subr.bf16.mxu0 %v2810_v14 }
  0x7b   :  { %733 = vmatpush1.bf16.msra.mxu0 %v2808_v15 }
  0x7c   :  { %734 = vmatprep.subr.bf16.mxu0 %v2813_v16 }
  0x7f   :  { %735 = vmatpush1.bf16.msra.mxu0 %v2811_v17 }
  0x80   :  { %745 = vmatprep.subr.bf16.mxu0 %v2816_v19 }
  0x82   :  { %737 = vmatmul.mubr.bf16.vlgmr.msra.gmra.mrb[0].mxu0 %v54_v21  ;;  %v2883_v21 = vld [vmem:[%s4083_s5 + $0x10] sm:$0xff]  }
  0x83   :  { %746 = vmatpush1.bf16.msra.mxu0 %v2814_v22  ;;  %777 = vmatprep.mubr.bf16.mxu0 %v57_v23  ;;  %v2884_v22 = vld [vmem:[%s4083_s5 + $0x18] sm:$0xff]   ;;  %v2885_v23 = vld [vmem:[%s4083_s5 + $0x20] sm:$0xff]  }
  0x84   :  { %747 = vmatprep.subr.bf16.mxu0 %v2819_v24  ;;  %v2886_v24 = vld [vmem:[%s4083_s5 + $0x28] sm:$0xff]  }
  0x87   :  { %748 = vmatpush1.bf16.msra.mxu0 %v2817_v25  ;;  %v2887_v25 = vld [vmem:[%s4083_s5 + $0x30] sm:$0xff]  }
  0x88   :  { %749 = vmatprep.subr.bf16.mxu0 %v2822_v26  ;;  %v2888_v26 = vld [vmem:[%s4083_s5 + $0x38] sm:$0xff]  }
  0x8b   :  { %750 = vmatpush1.bf16.msra.mxu0 %v2820_v27 }
  0x8c   :  { %751 = vmatprep.subr.bf16.mxu0 %v2825_v28  ;;  %v2436_v28 = vld [vmem:[%s4086_s4] ss:$0 sm:$0xff] }
  0x8f   :  { %752 = vmatpush1.bf16.msra.mxu0 %v2823_v29 }
  0x90   :  { %753 = vmatprep.subr.bf16.mxu0 %v2828_v30 }
  0x93   :  { %754 = vmatpush1.bf16.msra.mxu0 %v2826_v31 }
  0x94   :  { %755 = vmatprep.subr.bf16.mxu0 %v2831_v32 }
  0x97   :  { %756 = vmatpush1.bf16.msra.mxu0 %v2829_v33 }
  0x98   :  { %757 = vmatprep.subr.bf16.mxu0 %v2834_v34 }
  0x9b   :  { %758 = vmatpush1.bf16.msra.mxu0 %v2832_v35  ;;  %v2889_v35 = vld [vmem:[%s4085_s7] sm:$0xff]  }
  0x9c   :  { %759 = vmatprep.subr.bf16.mxu0 %v2837_v36 }
  0x9f   :  { %760 = vmatpush1.bf16.msra.mxu0 %v2835_v37  ;;  %v2890_v37 = vld [vmem:[%s4085_s7 + $0x8] sm:$0xff]  }
  0xa0   :  { %761 = vmatprep.subr.bf16.mxu0 %v2840_v38  ;;  %v2891_v38 = vld [vmem:[%s4085_s7 + $0x10] sm:$0xff]  }
  0xa3   :  { %762 = vmatpush1.bf16.msra.mxu0 %v2838_v39  ;;  %v2892_v39 = vld [vmem:[%s4085_s7 + $0x18] sm:$0xff]  }
  0xa4   :  { %763 = vmatprep.subr.bf16.mxu0 %v2843_v40  ;;  %v2893_v40 = vld [vmem:[%s4085_s7 + $0x20] sm:$0xff]  }
  0xa7   :  { %764 = vmatpush1.bf16.msra.mxu0 %v2841_v41  ;;  %v2894_v41 = vld [vmem:[%s4085_s7 + $0x28] sm:$0xff]  }
  0xa8   :  { %765 = vmatprep.subr.bf16.mxu0 %v2846_v42  ;;  %v2895_v42 = vld [vmem:[%s4085_s7 + $0x30] sm:$0xff]  }
  0xab   :  { %766 = vmatpush1.bf16.msra.mxu0 %v2844_v43  ;;  %v2896_v43 = vld [vmem:[%s4085_s7 + $0x38] sm:$0xff]  }
  0xac   :  { %767 = vmatprep.subr.bf16.mxu0 %v2849_v44  ;;  %v2899_v44 = vld [vmem:[%s4087_s9 + $0x4] ss:$8 sps:$4 sm:$0xff]  }
  0xaf   :  { %768 = vmatpush1.bf16.msra.mxu0 %v2847_v45  ;;  %v2453_v45 = vld [vmem:[%s4088_s6] ss:$0 sm:$0xff] }
  0xb0   :  { %769 = vmatprep.subr.bf16.mxu0 %v2852_v46 }
  0xb3   :  { %770 = vmatpush1.bf16.msra.mxu0 %v2850_v47 }
  0xb4   :  { %771 = vmatprep.subr.bf16.mxu0 %v2855_v48 }
  0xb7   :  { %772 = vmatpush1.bf16.msra.mxu0 %v2853_v49 }
  0xb8   :  { %773 = vmatprep.subr.bf16.mxu0 %v2858_v50 }
  0xbb   :  { %774 = vmatpush1.bf16.msra.mxu0 %v2856_v51 }
  0xbc   :  { %775 = vmatprep.subr.bf16.mxu0 %v2861_v52  ;;  %v2897_v52 = vld [vmem:[%s4087_s9] ss:$8 sps:$4 sm:$0xff]  }
  0xbf   :  { %776 = vmatpush1.bf16.msra.mxu0 %v2859_v53 }
  0xc0   :  { %786 = vmatprep.subr.bf16.mxu0 %v2864_v55  ;;  %v2900_v55 = vld [vmem:[%s4087_s9 + $0x10] ss:$8 sps:$4 sm:$0xff]  }
  0xc2   :  { %778 = vmatmul.mubr.bf16.vlgmr.msra.gmra.mrb[0].mxu0 %v56_v56  ;;  %v2905_v56 = vld [vmem:[%s4087_s9 + $0x24] ss:$8 sps:$4 sm:$0xff]  }
  0xc3   :  { %787 = vmatpush1.bf16.msra.mxu0 %v2862_v57  ;;  %818 = vmatprep.mubr.bf16.mxu0 %v3109_v58  ;;  %v2903_v57 = vld [vmem:[%s4087_s9 + $0x20] ss:$8 sps:$4 sm:$0xff]  }
  0xce   :  { %2435 = vmatmul.mubr.msk.bf16.vlgmr.msra.gmra.mrb[0].mxu0 %vm659_vm0, %v58_v60  ;;  %v2911_v60 = vld [vmem:[%s4087_s9 + $0x44] ss:$8 sps:$4 sm:$0xff]  }
 0x1a1   :  { %v820_v9 = vpop.f32.mrb[0].mxu0 }
 0x1a2   :  { %v2701_v10 = vadd.f32 %v820_v9, %v162_v7  ;;  %v822_v11 = vpop.f32.mrb[1].mxu0  ;;  %v2923_v7 = vld [vmem:[%s4089_s11 + $0x4] ss:$28 sps:$4 sm:$0xff]   ;;  %v2926_v9 = vld [vmem:[%s4089_s11 + $0x14] ss:$28 sps:$4 sm:$0xff]  }
 0x1a3   :  { %v2702_v12 = vadd.f32 %v822_v11, %v166_v8  ;;  %v824_v13 = vpop.f32.mrb[2].mxu0  ;;  %v2924_v8 = vld [vmem:[%s4089_s11 + $0x10] ss:$28 sps:$4 sm:$0xff]   ;;  %2210 = vmatprep.subr.bf16.mxu0 %v2926_v9  ;;  %v2999_v9 = vld [vmem:[%s4089_s11 + $0x2d8] ss:$28 sps:$4 sm:$0xff]  }
 0x1a4   :  { %v827_v14 = vmax.f32 %v2701_v10, 0.0  ;;  %v825_v15 = vpop.f32.mrb[3].mxu0  ;;  %v2930_v10 = vld [vmem:[%s4089_s11 + $0x48] ss:$28 sps:$4 sm:$0xff]   ;;  %2211 = vmatpush1.bf16.msra.mxu0 %v2924_v8  ;;  %v2936_v13 = vld [vmem:[%s4089_s11 + $0x80] ss:$28 sps:$4 sm:$0xff]  }
 0x1a5   :  { %v828_v16 = vmax.f32 %v2702_v12, 0.0  ;;  %v2932_v11 = vld [vmem:[%s4089_s11 + $0x4c] ss:$28 sps:$4 sm:$0xff]   ;;  %v2938_v12 = vld [vmem:[%s4089_s11 + $0x84] ss:$28 sps:$4 sm:$0xff]  }
 0x1a6   :  { %v829_v19 = vpack.c.bf16 %v827_v14, %v827_v14  ;;  %2212 = vmatprep.subr.bf16.mxu0 %v2932_v11  ;;  %v2944_v14 = vld [vmem:[%s4089_s11 + $0xbc] ss:$28 sps:$4 sm:$0xff]   ;;  %v3005_v11 = vld [vmem:[%s4089_s11 + $0x310] ss:$28 sps:$4 sm:$0xff]  }
 0x1a7   :  { %v830_v17 = vpack.c.bf16 %v828_v16, %v828_v16  ;;  %v2942_v15 = vld [vmem:[%s4089_s11 + $0xb8] ss:$28 sps:$4 sm:$0xff]  }
 0x1a8   :  { %2213 = vmatpush1.bf16.msra.mxu0 %v2930_v10  ;;  %v2950_v16 = vld [vmem:[%s4089_s11 + $0xf4] ss:$28 sps:$4 sm:$0xff]   ;;  %v3001_v8 = vld [vmem:[%s4089_s11 + $0x2dc] ss:$28 sps:$4 sm:$0xff]  }
 0x1a9   :  { %998 = vmatprep.mubr.bf16.mxu1 %v830_v17  ;;  %2214 = vmatprep.subr.bf16.mxu0 %v2938_v12  ;;  %v2948_v17 = vld [vmem:[%s4089_s11 + $0xf0] ss:$28 sps:$4 sm:$0xff]   ;;  %v3010_v12 = vld [vmem:[%s4089_s11 + $0x324] ss:$28 sps:$4 sm:$0xff]  }
 0x1aa   :  { %999 = vmatmul.mubr.bf16.vlgmr.msra.gmra.mrb[0].mxu1 %v829_v19  ;;  %v2954_v19 = vld [vmem:[%s4089_s11 + $0x128] ss:$28 sps:$4 sm:$0xff]   ;;  %v3007_v10 = vld [vmem:[%s4089_s11 + $0x314] ss:$28 sps:$4 sm:$0xff]  }
 0x1ab   :  { %2662 = vmatpush3.bf16.msra.mxu1 %v2881_v18  ;;  %2677 = vmatprep.mubr.msk.bf16.mxu1 %vm3111_vm1, %v3110_v1  ;;  %v2956_v18 = vld [vmem:[%s4089_s11 + $0x12c] ss:$28 sps:$4 sm:$0xff]  }
 0x1ac   :  { %2663 = vmatprep.subr.bf16.mxu1 %v3110_v1  ;;  %2215 = vmatpush1.bf16.msra.mxu0 %v2936_v13  ;;  %v3008_v13 = vld [vmem:[%s4089_s11 + $0x320] ss:$28 sps:$4 sm:$0xff]  }
 0x1ad   :  { %2216 = vmatprep.subr.bf16.mxu0 %v2944_v14  ;;  %v3013_v14 = vld [vmem:[%s4089_s11 + $0x34c] ss:$28 sps:$4 sm:$0xff]  }
 0x1af   :  { %2664 = vmatpush3.bf16.msra.mxu1 %v2882_v20  ;;  %v2962_v20 = vld [vmem:[%s4089_s11 + $0x164] ss:$28 sps:$4 sm:$0xff]  }
 0x1b0   :  { %2665 = vmatprep.subr.bf16.mxu1 %v3110_v1  ;;  %2217 = vmatpush1.bf16.msra.mxu0 %v2942_v15  ;;  %v3011_v15 = vld [vmem:[%s4089_s11 + $0x348] ss:$28 sps:$4 sm:$0xff]  }
 0x1b1   :  { %2218 = vmatprep.subr.bf16.mxu0 %v2950_v16  ;;  %v3016_v16 = vld [vmem:[%s4089_s11 + $0x35c] ss:$28 sps:$4 sm:$0xff]  }
 0x1b3   :  { %2666 = vmatpush3.bf16.msra.mxu1 %v2883_v21  ;;  %v2960_v21 = vld [vmem:[%s4089_s11 + $0x160] ss:$28 sps:$4 sm:$0xff]  }
 0x1b4   :  { %2667 = vmatprep.subr.bf16.mxu1 %v3110_v1  ;;  %2219 = vmatpush1.bf16.msra.mxu0 %v2948_v17  ;;  %v3014_v17 = vld [vmem:[%s4089_s11 + $0x358] ss:$28 sps:$4 sm:$0xff]  }
 0x1b5   :  { %2220 = vmatprep.subr.bf16.mxu0 %v2956_v18  ;;  %v3019_v18 = vld [vmem:[%s4089_s11 + $0xc] ss:$28 sps:$4 sm:$0xff]  }
 0x1b7   :  { %2668 = vmatpush3.bf16.msra.mxu1 %v2884_v22  ;;  %v2968_v22 = vld [vmem:[%s4089_s11 + $0x19c] ss:$28 sps:$4 sm:$0xff]  }
 0x1b8   :  { %2669 = vmatprep.subr.bf16.mxu1 %v3110_v1  ;;  %2221 = vmatpush1.bf16.msra.mxu0 %v2954_v19  ;;  %v1250_v19 = vld [vmem:[%s4091_s10] sm:$0x3] }
 0x1b9   :  { %2222 = vmatprep.subr.bf16.mxu0 %v2962_v20  ;;  %v1255_v20 = vrot.slane %v1250_v19, %v3551_v4 }
 0x1bb   :  { %2670 = vmatpush3.bf16.msra.mxu1 %v2885_v23  ;;  %v2966_v23 = vld [vmem:[%s4089_s11 + $0x198] ss:$28 sps:$4 sm:$0xff]  }
 0x1bc   :  { %2671 = vmatprep.subr.bf16.mxu1 %v3110_v1  ;;  %2223 = vmatpush1.bf16.msra.mxu0 %v2960_v21  ;;  %v1259_v21 = vrot.slane %v1250_v19, %v3557_v6  ;;  %v4043_v19 = vld [vmem:[%s4092_s12] sm:$0x7f] }
 0x1bd   :  { %2224 = vmatprep.subr.bf16.mxu0 %v2968_v22 }
 0x1bf   :  { %2672 = vmatpush3.bf16.msra.mxu1 %v2886_v24  ;;  %v2974_v24 = vld [vmem:[%s4089_s11 + $0x1d4] ss:$28 sps:$4 sm:$0xff]  }
 0x1c0   :  { %2673 = vmatprep.subr.bf16.mxu1 %v3110_v1  ;;  %2225 = vmatpush1.bf16.msra.mxu0 %v2966_v23 }
 0x1c1   :  { %2226 = vmatprep.subr.bf16.mxu0 %v2974_v24 }
 0x1c3   :  { %2674 = vmatpush3.bf16.msra.mxu1 %v2887_v25  ;;  %v2972_v25 = vld [vmem:[%s4089_s11 + $0x1d0] ss:$28 sps:$4 sm:$0xff]  }
 0x1c4   :  { %2675 = vmatprep.subr.bf16.mxu1 %v3110_v1  ;;  %2227 = vmatpush1.bf16.msra.mxu0 %v2972_v25 }
 0x1c7   :  { %2676 = vmatpush3.bf16.msra.mxu1 %v2888_v26  ;;  %v2980_v26 = vld [vmem:[%s4089_s11 + $0x20c] ss:$28 sps:$4 sm:$0xff]  }
 0x1c8   :  { %2681 = vmatprep.subr.bf16.mxu1 %v3110_v1  ;;  %2228 = vmatprep.subr.bf16.mxu0 %v2980_v26 }
 0x27d   :  { %v2615_v27 = vpop.f32.mrb[0].mxu1 }
 0x27e   :  { %v2616_v29 = vpop.f32.mrb[1].mxu1 }
 0x27f   :  { %v2617_v30 = vadd.f32 %v2616_v29, %v2615_v27  ;;  %v2618_v31 = vpop.f32.mrb[2].mxu1  ;;  %v2978_v27 = vld [vmem:[%s4089_s11 + $0x208] ss:$28 sps:$4 sm:$0xff]   ;;  %v2984_v29 = vld [vmem:[%s4089_s11 + $0x240] ss:$28 sps:$4 sm:$0xff]  }
 0x280   :  { %v2619_v32 = vpop.f32.mrb[3].mxu1  ;;  %2229 = vmatpush1.bf16.msra.mxu0 %v2978_v27  ;;  %v2990_v31 = vld [vmem:[%s4089_s11 + $0x278] ss:$28 sps:$4 sm:$0xff]  }
 0x281   :  { %v1001_v33 = vadd.f32 %v2617_v30, %v2436_v28  ;;  %v2986_v28 = vld [vmem:[%s4089_s11 + $0x244] ss:$28 sps:$4 sm:$0xff]   ;;  %v2992_v30 = vld [vmem:[%s4089_s11 + $0x27c] ss:$28 sps:$4 sm:$0xff]   ;;  %v2998_v32 = vld [vmem:[%s4089_s11 + $0x2b4] ss:$28 sps:$4 sm:$0xff]  }
 0x282   :  { %2230 = vmatprep.subr.bf16.mxu0 %v2986_v28 }
 0x283   :  { %v1006_v34 = vmax.f32 %v1001_v33, 0.0  ;;  %v2996_v33 = vld [vmem:[%s4089_s11 + $0x2b0] ss:$28 sps:$4 sm:$0xff]  }
 0x284   :  { %2231 = vmatpush1.bf16.msra.mxu0 %v2984_v29 }
 0x285   :  { %v1007_v36 = vpack.c.bf16 %v1006_v34, %v1006_v34  ;;  %2232 = vmatprep.subr.bf16.mxu0 %v2992_v30  ;;  %v3004_v34 = vld [vmem:[%s4089_s11 + $0x2ec] ss:$28 sps:$4 sm:$0xff]  }
 0x287   :  { %2678 = vmatmul.mubr.bf16.vlgmr.msra.gmra.mrb[4].mxu1 %v1007_v36  ;;  %v2462_v36 = vld [vmem:[%s4090_s8] ss:$0 sm:$0xff] }
 0x288   :  { %2682 = vmatpush3.bf16.msra.mxu1 %v2889_v35  ;;  %2697 = vmatprep.mubr.msk.bf16.mxu1 %vm3111_vm1, %v3110_v1  ;;  %v3002_v35 = vld [vmem:[%s4089_s11 + $0x2e8] ss:$28 sps:$4 sm:$0xff]  }
 0x289   :  { %2683 = vmatprep.subr.bf16.mxu1 %v3110_v1  ;;  %2233 = vmatpush1.bf16.msra.mxu0 %v2990_v31  ;;  %v3017_v31 = vld [vmem:[%s4089_s11 + $0x8] ss:$28 sps:$4 sm:$0xff]  }
 0x28a   :  { %2234 = vmatprep.subr.bf16.mxu0 %v2998_v32 }
 0x28c   :  { %2684 = vmatpush3.bf16.msra.mxu1 %v2890_v37 }
 0x28d   :  { %2685 = vmatprep.subr.bf16.mxu1 %v3110_v1  ;;  %2235 = vmatpush1.bf16.msra.mxu0 %v2996_v33  ;;  %v3022_v33 = vld [vmem:[%s4089_s11 + $0x44] ss:$28 sps:$4 sm:$0xff]  }
 0x28e   :  { %2236 = vmatprep.subr.bf16.mxu0 %v3004_v34  ;;  %v3020_v34 = vld [vmem:[%s4089_s11 + $0x40] ss:$28 sps:$4 sm:$0xff]  }
 0x290   :  { %2686 = vmatpush3.bf16.msra.mxu1 %v2891_v38 }
 0x291   :  { %2687 = vmatprep.subr.bf16.mxu1 %v3110_v1  ;;  %2237 = vmatpush1.bf16.msra.mxu0 %v3002_v35  ;;  %v3025_v35 = vld [vmem:[%s4089_s11 + $0x7c] ss:$28 sps:$4 sm:$0xff]  }
 0x292   :  { %2238 = vmatprep.subr.bf16.mxu0 %v3010_v12  ;;  %v3075_v12 = vld [vmem:[%s4089_s11 + $0x2f0] ss:$28 sps:$4 sm:$0xff]  }
 0x294   :  { %2688 = vmatpush3.bf16.msra.mxu1 %v2892_v39 }
 0x295   :  { %2689 = vmatprep.subr.bf16.mxu1 %v3110_v1  ;;  %2239 = vmatpush1.bf16.msra.mxu0 %v3008_v13  ;;  %v3076_v13 = vld [vmem:[%s4089_s11 + $0x130] ss:$28 sps:$4 sm:$0xff]  }
 0x296   :  { %2240 = vmatprep.subr.bf16.mxu0 %v3016_v16  ;;  %v3079_v16 = vld [vmem:[%s4089_s11 + $0x360] ss:$28 sps:$4 sm:$0xff]  }
 0x298   :  { %2690 = vmatpush3.bf16.msra.mxu1 %v2893_v40 }
 0x299   :  { %2691 = vmatprep.subr.bf16.mxu1 %v3110_v1  ;;  %2241 = vmatpush1.bf16.msra.mxu0 %v3014_v17  ;;  %v3080_v17 = vld [vmem:[%s4089_s11 + $0x1a0] ss:$28 sps:$4 sm:$0xff]  }
 0x29c   :  { %2692 = vmatpush3.bf16.msra.mxu1 %v2894_v41 }
 0x29d   :  { %2693 = vmatprep.subr.bf16.mxu1 %v3110_v1 }
 0x2a0   :  { %2694 = vmatpush3.bf16.msra.mxu1 %v2895_v42 }
 0x2a1   :  { %2695 = vmatprep.subr.bf16.mxu1 %v3110_v1  ;;  %v2915_v1 = vld [vmem:[%s4087_s9 + $0x60] ss:$8 sps:$4 sm:$0xff]  }
 0x2a4   :  { %2696 = vmatpush3.bf16.msra.mxu1 %v2896_v43  ;;  %v2921_v43 = vld [vmem:[%s4089_s11] ss:$28 sps:$4 sm:$0xff]  }
 0x2a5   :  { %1342 = vmatprep.subr.bf16.mxu1 %v2899_v44 }
 0x35a   :  { %v1113_v46 = vpop.f32.mrb[4].mxu1 }
 0x35b   :  { %v1114_v47 = vadd.f32 %v2453_v45, %v1113_v46  ;;  %v2679_v48 = vpop.f32.mrb[5].mxu1  ;;  %v2929_v45 = vld [vmem:[%s4089_s11 + $0x3c] ss:$28 sps:$4 sm:$0xff]  }
 0x35c   :  { %v1116_v49 = vpop.f32.mrb[6].mxu1  ;;  %v2927_v46 = vld [vmem:[%s4089_s11 + $0x38] ss:$28 sps:$4 sm:$0xff]   ;;  %v2933_v48 = vld [vmem:[%s4089_s11 + $0x70] ss:$28 sps:$4 sm:$0xff]  }
 0x35d   :  { %v1119_v50 = vmax.f32 %v1114_v47, 0.0  ;;  %v2680_v51 = vpop.f32.mrb[7].mxu1  ;;  %v2935_v47 = vld [vmem:[%s4089_s11 + $0x74] ss:$28 sps:$4 sm:$0xff]   ;;  %v2941_v49 = vld [vmem:[%s4089_s11 + $0xac] ss:$28 sps:$4 sm:$0xff]  }
 0x35e   :  { %v2947_v51 = vld [vmem:[%s4089_s11 + $0xe4] ss:$28 sps:$4 sm:$0xff]  }
 0x35f   :  { %v1120_v53 = vpack.c.bf16 %v1119_v50, %v1119_v50  ;;  %v2939_v50 = vld [vmem:[%s4089_s11 + $0xa8] ss:$28 sps:$4 sm:$0xff]  }
 0x361   :  { %2698 = vmatmul.mubr.bf16.vlgmr.msra.gmra.mrb[8].mxu1 %v1120_v53  ;;  %v2953_v53 = vld [vmem:[%s4089_s11 + $0x11c] ss:$28 sps:$4 sm:$0xff]  }
 0x362   :  { %1343 = vmatpush1.bf16.msra.mxu1 %v2897_v52  ;;  %1374 = vmatprep.mubr.bf16.mxu1 %v3109_v58  ;;  %v2906_v58 = vld [vmem:[%s4087_s9 + $0x30] ss:$8 sps:$4 sm:$0xff]   ;;  %v2945_v52 = vld [vmem:[%s4089_s11 + $0xe0] ss:$28 sps:$4 sm:$0xff]  }
 0x363   :  { %1344 = vmatprep.subr.bf16.mxu1 %v2902_v54  ;;  %v2951_v54 = vld [vmem:[%s4089_s11 + $0x118] ss:$28 sps:$4 sm:$0xff]  }
 0x366   :  { %1345 = vmatpush1.bf16.msra.mxu1 %v2900_v55  ;;  %v2959_v55 = vld [vmem:[%s4089_s11 + $0x154] ss:$28 sps:$4 sm:$0xff]  }
 0x367   :  { %1346 = vmatprep.subr.bf16.mxu1 %v2905_v56  ;;  %v2957_v56 = vld [vmem:[%s4089_s11 + $0x150] ss:$28 sps:$4 sm:$0xff]  }
 0x36a   :  { %1347 = vmatpush1.bf16.msra.mxu1 %v2903_v57  ;;  %v2965_v57 = vld [vmem:[%s4089_s11 + $0x18c] ss:$28 sps:$4 sm:$0xff]  }
 0x36b   :  { %1348 = vmatprep.subr.bf16.mxu1 %v2908_v59  ;;  %v2963_v59 = vld [vmem:[%s4089_s11 + $0x188] ss:$28 sps:$4 sm:$0xff]  }
 0x36e   :  { %1349 = vmatpush1.bf16.msra.mxu1 %v2906_v58  ;;  %v2971_v58 = vld [vmem:[%s4089_s11 + $0x1c4] ss:$28 sps:$4 sm:$0xff]  }
 0x36f   :  { %1350 = vmatprep.subr.bf16.mxu1 %v2911_v60  ;;  %v2969_v60 = vld [vmem:[%s4089_s11 + $0x1c0] ss:$28 sps:$4 sm:$0xff]  }
 0x372   :  { %1351 = vmatpush1.bf16.msra.mxu1 %v2909_v61  ;;  %v2977_v61 = vld [vmem:[%s4089_s11 + $0x1fc] ss:$28 sps:$4 sm:$0xff]  }
 0x373   :  { %1352 = vmatprep.subr.bf16.mxu1 %v2914_v62  ;;  %v2975_v62 = vld [vmem:[%s4089_s11 + $0x1f8] ss:$28 sps:$4 sm:$0xff]  }
 0x376   :  { %1353 = vmatpush1.bf16.msra.mxu1 %v2912_v63  ;;  %v2983_v63 = vld [vmem:[%s4089_s11 + $0x234] ss:$28 sps:$4 sm:$0xff]  }
 0x377   :  { %1354 = vmatprep.subr.bf16.mxu1 %v2917_v0  ;;  %v2981_v0 = vld [vmem:[%s4089_s11 + $0x230] ss:$28 sps:$4 sm:$0xff]  }
 0x37a   :  { %1355 = vmatpush1.bf16.msra.mxu1 %v2915_v1  ;;  %v2989_v1 = vld [vmem:[%s4089_s11 + $0x26c] ss:$28 sps:$4 sm:$0xff]  }
 0x37b   :  { %1356 = vmatprep.subr.bf16.mxu1 %v2920_v2  ;;  %v2987_v2 = vld [vmem:[%s4089_s11 + $0x268] ss:$28 sps:$4 sm:$0xff]  }
 0x37e   :  { %1357 = vmatpush1.bf16.msra.mxu1 %v2918_v5  ;;  %v2995_v5 = vld [vmem:[%s4089_s11 + $0x2a4] ss:$28 sps:$4 sm:$0xff]  }
 0x37f   :  { %2128 = vmatprep.subr.bf16.mxu1 %v2923_v7  ;;  %v2993_v7 = vld [vmem:[%s4089_s11 + $0x2a0] ss:$28 sps:$4 sm:$0xff]  }
 0x434   :  { %v1226_v37 = vpop.f32.mrb[8].mxu1 }
 0x435   :  { %v1227_v38 = vadd.f32 %v2462_v36, %v1226_v37  ;;  %v2699_v39 = vpop.f32.mrb[9].mxu1  ;;  %v3023_v36 = vld [vmem:[%s4089_s11 + $0x78] ss:$28 sps:$4 sm:$0xff]  }
 0x436   :  { %v1229_v40 = vpop.f32.mrb[10].mxu1  ;;  %v3028_v37 = vld [vmem:[%s4089_s11 + $0xb4] ss:$28 sps:$4 sm:$0xff]   ;;  %v3031_v39 = vld [vmem:[%s4089_s11 + $0xec] ss:$28 sps:$4 sm:$0xff]  }
 0x437   :  { %v1232_v41 = vmax.f32 %v1227_v38, 0.0  ;;  %v2700_v42 = vpop.f32.mrb[11].mxu1  ;;  %v3026_v38 = vld [vmem:[%s4089_s11 + $0xb0] ss:$28 sps:$4 sm:$0xff]   ;;  %v3029_v40 = vld [vmem:[%s4089_s11 + $0xe8] ss:$28 sps:$4 sm:$0xff]  }
 0x438   :  { %v3032_v42 = vld [vmem:[%s4089_s11 + $0x120] ss:$28 sps:$4 sm:$0xff]  }
 0x439   :  { %v1233_v44 = vpack.c.bf16 %v1232_v41, %v1232_v41  ;;  %v3034_v41 = vld [vmem:[%s4089_s11 + $0x124] ss:$28 sps:$4 sm:$0xff]  }
 0x43b   :  { %1375 = vmatmul.mubr.bf16.vlgmr.msra.gmra.mrb[12].mxu1 %v1233_v44  ;;  %v3035_v44 = vld [vmem:[%s4089_s11 + $0x158] ss:$28 sps:$4 sm:$0xff]  }
 0x43c   :  { %2129 = vmatpush1.bf16.msra.mxu1 %v2921_v43  ;;  %v3037_v43 = vld [vmem:[%s4089_s11 + $0x15c] ss:$28 sps:$4 sm:$0xff]  }
 0x43d   :  { %2130 = vmatprep.subr.bf16.mxu1 %v2929_v45  ;;  %v3040_v45 = vld [vmem:[%s4089_s11 + $0x194] ss:$28 sps:$4 sm:$0xff]  }
 0x440   :  { %2131 = vmatpush1.bf16.msra.mxu1 %v2927_v46  ;;  %v3038_v46 = vld [vmem:[%s4089_s11 + $0x190] ss:$28 sps:$4 sm:$0xff]  }
 0x441   :  { %2132 = vmatprep.subr.bf16.mxu1 %v2935_v47  ;;  %v3043_v47 = vld [vmem:[%s4089_s11 + $0x1cc] ss:$28 sps:$4 sm:$0xff]  }
 0x444   :  { %2133 = vmatpush1.bf16.msra.mxu1 %v2933_v48  ;;  %v3041_v48 = vld [vmem:[%s4089_s11 + $0x1c8] ss:$28 sps:$4 sm:$0xff]  }
 0x445   :  { %2134 = vmatprep.subr.bf16.mxu1 %v2941_v49  ;;  %v3046_v49 = vld [vmem:[%s4089_s11 + $0x204] ss:$28 sps:$4 sm:$0xff]  }
 0x448   :  { %2135 = vmatpush1.bf16.msra.mxu1 %v2939_v50  ;;  %v3044_v50 = vld [vmem:[%s4089_s11 + $0x200] ss:$28 sps:$4 sm:$0xff]  }
 0x449   :  { %2136 = vmatprep.subr.bf16.mxu1 %v2947_v51  ;;  %v3049_v51 = vld [vmem:[%s4089_s11 + $0x23c] ss:$28 sps:$4 sm:$0xff]  }
 0x44c   :  { %2137 = vmatpush1.bf16.msra.mxu1 %v2945_v52  ;;  %v3047_v52 = vld [vmem:[%s4089_s11 + $0x238] ss:$28 sps:$4 sm:$0xff]  }
 0x44d   :  { %2138 = vmatprep.subr.bf16.mxu1 %v2953_v53  ;;  %v3052_v53 = vld [vmem:[%s4089_s11 + $0x274] ss:$28 sps:$4 sm:$0xff]  }
 0x450   :  { %2139 = vmatpush1.bf16.msra.mxu1 %v2951_v54  ;;  %v3050_v54 = vld [vmem:[%s4089_s11 + $0x270] ss:$28 sps:$4 sm:$0xff]  }
 0x451   :  { %2140 = vmatprep.subr.bf16.mxu1 %v2959_v55  ;;  %v3055_v55 = vld [vmem:[%s4089_s11 + $0x2ac] ss:$28 sps:$4 sm:$0xff]  }
 0x454   :  { %2141 = vmatpush1.bf16.msra.mxu1 %v2957_v56  ;;  %v3053_v56 = vld [vmem:[%s4089_s11 + $0x2a8] ss:$28 sps:$4 sm:$0xff]  }
 0x455   :  { %2142 = vmatprep.subr.bf16.mxu1 %v2965_v57  ;;  %v3058_v57 = vld [vmem:[%s4089_s11 + $0x2e4] ss:$28 sps:$4 sm:$0xff]  }
 0x458   :  { %2143 = vmatpush1.bf16.msra.mxu1 %v2963_v59  ;;  %v3056_v59 = vld [vmem:[%s4089_s11 + $0x2e0] ss:$28 sps:$4 sm:$0xff]  }
 0x459   :  { %2144 = vmatprep.subr.bf16.mxu1 %v2971_v58  ;;  %v3061_v58 = vld [vmem:[%s4089_s11 + $0x31c] ss:$28 sps:$4 sm:$0xff]  }
 0x45c   :  { %2145 = vmatpush1.bf16.msra.mxu1 %v2969_v60  ;;  %v3059_v60 = vld [vmem:[%s4089_s11 + $0x318] ss:$28 sps:$4 sm:$0xff]  }
 0x45d   :  { %2146 = vmatprep.subr.bf16.mxu1 %v2977_v61  ;;  %v3064_v61 = vld [vmem:[%s4089_s11 + $0x354] ss:$28 sps:$4 sm:$0xff]  }
 0x460   :  { %2147 = vmatpush1.bf16.msra.mxu1 %v2975_v62  ;;  %v3062_v62 = vld [vmem:[%s4089_s11 + $0x350] ss:$28 sps:$4 sm:$0xff]  }
 0x461   :  { %2148 = vmatprep.subr.bf16.mxu1 %v2983_v63  ;;  %v3065_v63 = vld [vmem:[%s4089_s11 + $0x1d8] ss:$28 sps:$4 sm:$0xff]  }
 0x464   :  { %2149 = vmatpush1.bf16.msra.mxu1 %v2981_v0  ;;  %v3066_v0 = vld [vmem:[%s4089_s11 + $0x18] ss:$28 sps:$4 sm:$0xff]  }
 0x465   :  { %2150 = vmatprep.subr.bf16.mxu1 %v2989_v1  ;;  %v3067_v1 = vld [vmem:[%s4089_s11 + $0x210] ss:$28 sps:$4 sm:$0xff]  }
 0x468   :  { %2151 = vmatpush1.bf16.msra.mxu1 %v2987_v2  ;;  %v3068_v2 = vld [vmem:[%s4089_s11 + $0x50] ss:$28 sps:$4 sm:$0xff]  }
 0x469   :  { %2152 = vmatprep.subr.bf16.mxu1 %v2995_v5  ;;  %v3069_v5 = vld [vmem:[%s4089_s11 + $0x248] ss:$28 sps:$4 sm:$0xff]  }
 0x46c   :  { %2153 = vmatpush1.bf16.msra.mxu1 %v2993_v7  ;;  %v3070_v7 = vld [vmem:[%s4089_s11 + $0x88] ss:$28 sps:$4 sm:$0xff]  }
 0x46d   :  { %2154 = vmatprep.subr.bf16.mxu1 %v3001_v8  ;;  %v3071_v8 = vld [vmem:[%s4089_s11 + $0x280] ss:$28 sps:$4 sm:$0xff]  }
 0x470   :  { %2155 = vmatpush1.bf16.msra.mxu1 %v2999_v9  ;;  %v3072_v9 = vld [vmem:[%s4089_s11 + $0xc0] ss:$28 sps:$4 sm:$0xff]  }
 0x471   :  { %2156 = vmatprep.subr.bf16.mxu1 %v3007_v10  ;;  %v3073_v10 = vld [vmem:[%s4089_s11 + $0x2b8] ss:$28 sps:$4 sm:$0xff]  }
 0x474   :  { %2157 = vmatpush1.bf16.msra.mxu1 %v3005_v11  ;;  %v3074_v11 = vld [vmem:[%s4089_s11 + $0xf8] ss:$28 sps:$4 sm:$0xff]  }
 0x475   :  { %2158 = vmatprep.subr.bf16.mxu1 %v3013_v14  ;;  %v3077_v14 = vld [vmem:[%s4089_s11 + $0x328] ss:$28 sps:$4 sm:$0xff]  }
 0x478   :  { %2159 = vmatpush1.bf16.msra.mxu1 %v3011_v15  ;;  %v3078_v15 = vld [vmem:[%s4089_s11 + $0x168] ss:$28 sps:$4 sm:$0xff]  }
 0x479   :  { %2169 = vmatprep.subr.bf16.mxu1 %v3019_v18  ;;  %v1535_v18 = vsub.s32 4, %v3548_v3 }
 0x50e   :  { %v1376_v22 = vpop.f32.mrb[12].mxu1 }
 0x50f   :  { %v1377_v23 = vadd.f32 %v1376_v22, %v1255_v20  ;;  %v1378_v24 = vpop.f32.mrb[13].mxu1  ;;  %v1539_v20 = vsub.s32 5, %v3548_v3  ;;  %v1536_v22 = vrot.slane %v4043_v19, %v1535_v18 }
 0x510   :  { %v1379_v25 = vadd.f32 %v1378_v24, %v1259_v21  ;;  %v1380_v26 = vpop.f32.mrb[14].mxu1  ;;  %v1520_v21 = vrot.slane %v4043_v19, %v3551_v4 }
 0x511   :  { %v1383_v27 = vmax.f32 %v1377_v23, 0.0  ;;  %v1381_v28 = vpop.f32.mrb[15].mxu1  ;;  %v1524_v23 = vrot.slane %v4043_v19, %v3557_v6  ;;  %v1540_v24 = vrot.slane %v4043_v19, %v1539_v20 }
 0x512   :  { %v1384_v29 = vmax.f32 %v1379_v25, 0.0 }
 0x513   :  { %v3891_v32 = vpack.c.bf16 %v1383_v27, %v1383_v27 }
 0x514   :  { %v3886_v30 = vpack.c.bf16 %v1384_v29, %v1384_v29 }
 0x516   :  { %2160 = vmatprep.mubr.bf16.mxu1 %v3886_v30  ;;  %2242 = vmatprep.mubr.bf16.mxu0 %v3886_v30 }
 0x517   :  { %2161 = vmatmul.mubr.bf16.vlgmr.msra.gmra.mrb[16].mxu1 %v3891_v32  ;;  %2243 = vmatmul.mubr.bf16.vlgmr.msra.gmra.mrb[4].mxu0 %v3891_v32 }
 0x518   :  { %2170 = vmatpush1.bf16.msra.mxu1 %v3017_v31  ;;  %2201 = vmatprep.mubr.bf16.mxu1 %v3886_v30 }
 0x519   :  { %2171 = vmatprep.subr.bf16.mxu1 %v3022_v33 }
 0x51c   :  { %2172 = vmatpush1.bf16.msra.mxu1 %v3020_v34 }
 0x51d   :  { %2173 = vmatprep.subr.bf16.mxu1 %v3025_v35 }
 0x520   :  { %2174 = vmatpush1.bf16.msra.mxu1 %v3023_v36 }
 0x521   :  { %2175 = vmatprep.subr.bf16.mxu1 %v3028_v37 }
 0x524   :  { %2176 = vmatpush1.bf16.msra.mxu1 %v3026_v38 }
 0x525   :  { %2177 = vmatprep.subr.bf16.mxu1 %v3031_v39 }
 0x528   :  { %2178 = vmatpush1.bf16.msra.mxu1 %v3029_v40 }
 0x529   :  { %2179 = vmatprep.subr.bf16.mxu1 %v3034_v41 }
 0x52c   :  { %2180 = vmatpush1.bf16.msra.mxu1 %v3032_v42 }
 0x52d   :  { %2181 = vmatprep.subr.bf16.mxu1 %v3037_v43 }
 0x530   :  { %2182 = vmatpush1.bf16.msra.mxu1 %v3035_v44 }
 0x531   :  { %2183 = vmatprep.subr.bf16.mxu1 %v3040_v45 }
 0x534   :  { %2184 = vmatpush1.bf16.msra.mxu1 %v3038_v46 }
 0x535   :  { %2185 = vmatprep.subr.bf16.mxu1 %v3043_v47 }
 0x538   :  { %2186 = vmatpush1.bf16.msra.mxu1 %v3041_v48 }
 0x539   :  { %2187 = vmatprep.subr.bf16.mxu1 %v3046_v49 }
 0x53c   :  { %2188 = vmatpush1.bf16.msra.mxu1 %v3044_v50 }
 0x53d   :  { %2189 = vmatprep.subr.bf16.mxu1 %v3049_v51 }
 0x540   :  { %2190 = vmatpush1.bf16.msra.mxu1 %v3047_v52 }
 0x541   :  { %2191 = vmatprep.subr.bf16.mxu1 %v3052_v53 }
 0x544   :  { %2192 = vmatpush1.bf16.msra.mxu1 %v3050_v54 }
 0x545   :  { %2193 = vmatprep.subr.bf16.mxu1 %v3055_v55  ;;  %v1527_v55 = vsub.s32 2, %v3548_v3 }
 0x548   :  { %2194 = vmatpush1.bf16.msra.mxu1 %v3053_v56  ;;  %v1531_v56 = vsub.s32 3, %v3548_v3 }
 0x549   :  { %2195 = vmatprep.subr.bf16.mxu1 %v3058_v57  ;;  %v1528_v57 = vrot.slane %v4043_v19, %v1527_v55 }
 0x54c   :  { %2196 = vmatpush1.bf16.msra.mxu1 %v3056_v59  ;;  %v1532_v59 = vrot.slane %v4043_v19, %v1531_v56 }
 0x54d   :  { %2197 = vmatprep.subr.bf16.mxu1 %v3061_v58 }
 0x550   :  { %2198 = vmatpush1.bf16.msra.mxu1 %v3059_v60 }
 0x551   :  { %2199 = vmatprep.subr.bf16.mxu1 %v3064_v61 }
 0x554   :  { %2200 = vmatpush1.bf16.msra.mxu1 %v3062_v62 }
 0x555   :  { %2639 = vmatprep.subr.bf16.mxu1 %v3065_v63 }
 0x557   :  { %2202 = vmatmul.mubr.bf16.vlgmr.msra.gmra.mrb[20].mxu1 %v3891_v32 }
 0x558   :  { %2640 = vmatpush3.bf16.msra.mxu1 %v3066_v0  ;;  %2283 = vmatprep.mubr.bf16.mxu1 %v3886_v30 }
 0x559   :  { %2641 = vmatprep.subr.bf16.mxu1 %v3067_v1 }
 0x55c   :  { %2642 = vmatpush3.bf16.msra.mxu1 %v3068_v2 }
 0x55d   :  { %2643 = vmatprep.subr.bf16.mxu1 %v3069_v5 }
 0x560   :  { %2644 = vmatpush3.bf16.msra.mxu1 %v3070_v7 }
 0x561   :  { %2645 = vmatprep.subr.bf16.mxu1 %v3071_v8 }
 0x564   :  { %2646 = vmatpush3.bf16.msra.mxu1 %v3072_v9 }
 0x565   :  { %2647 = vmatprep.subr.bf16.mxu1 %v3073_v10 }
 0x568   :  { %2648 = vmatpush3.bf16.msra.mxu1 %v3074_v11 }
 0x569   :  { %2649 = vmatprep.subr.bf16.mxu1 %v3075_v12  ;;  %v1543_v12 = vsub.s32 6, %v3548_v3 }
 0x56c   :  { %2650 = vmatpush3.bf16.msra.mxu1 %v3076_v13 }
 0x56d   :  { %2651 = vmatprep.subr.bf16.mxu1 %v3077_v14 }
 0x570   :  { %2652 = vmatpush3.bf16.msra.mxu1 %v3078_v15 }
 0x571   :  { %2653 = vmatprep.subr.bf16.mxu1 %v3079_v16  ;;  %v1544_v16 = vrot.slane %v4043_v19, %v1543_v12 }
 0x574   :  { %2654 = vmatpush3.bf16.msra.mxu1 %v3080_v17 }
 0x577   :  { %2284 = vmatmul.mubr.bf16.vlgmr.msra.gmra.mrb[24].mxu1 %v3891_v32 }
 0x5ea   :  { %v2162_v25 = vpop.f32.mrb[16].mxu1  ;;  %v2244_v26 = vpop.f32.mrb[4].mxu0 }
 0x5eb   :  { %v2163_v27 = vadd.f32 %v2162_v25, %v1520_v21  ;;  %v2245_v28 = vadd.f32 %v2244_v26, %v1536_v22  ;;  %v2164_v29 = vpop.f32.mrb[17].mxu1  ;;  %v2246_v30 = vpop.f32.mrb[5].mxu0 }
 0x5ec   :  { %v2165_v31 = vadd.f32 %v2164_v29, %v1524_v23  ;;  %v2247_v32 = vadd.f32 %v2246_v30, %v1540_v24  ;;  %v2166_v33 = vpop.f32.mrb[18].mxu1  ;;  %v2248_v34 = vpop.f32.mrb[6].mxu0 }
 0x5ed   :  { %v2291_v35 = vsub.f32 0.0, %v2163_v27  ;;  %v2295_v36 = vsub.f32 0.0, %v2245_v28  ;;  %v2167_v4 = vpop.f32.mrb[19].mxu1  ;;  %v2249_v37 = vpop.f32.mrb[7].mxu0 }
 0x5ee   :  { %v2292_v38 = vsub.f32 0.0, %v2165_v31  ;;  %v2296_v39 = vsub.f32 0.0, %v2247_v32 }
 0x5ef   :  { %v2298_v40 = vmul.f32 1.442695, %v2291_v35  ;;  %v2306_v6 = vmul.f32 1.442695, %v2295_v36 }
 0x5f0   :  { %v2300_v41 = vmul.f32 1.442695, %v2292_v38  ;;  %v2308_v42 = vmul.f32 1.442695, %v2296_v39 }
 0x5f1   :  { %3081 = vpow2.f32 %v2298_v40 }
 0x5f2   :  { %3083 = vpow2.f32 %v2306_v6 }
 0x5f3   :  { %3085 = vpow2.f32 %v2300_v41 }
 0x5f4   :  { %3087 = vpow2.f32 %v2308_v42 }
 0x5fb   :  { %v3082_v43 = vpop.eup %3081 }
 0x5fc   :  { %v3084_v44 = vpop.eup %3083  ;;  %v2312_v45 = vadd.f32 1.0, %v3082_v43 }
 0x5fd   :  { %v3086_v46 = vpop.eup %3085  ;;  %v2316_v47 = vadd.f32 1.0, %v3084_v44 }
 0x5fe   :  { %v3088_v48 = vpop.eup %3087  ;;  %3089 = vrcp.f32 %v2312_v45  ;;  %v2313_v49 = vadd.f32 1.0, %v3086_v46 }
 0x5ff   :  { %3091 = vrcp.f32 %v2316_v47  ;;  %v2317_v50 = vadd.f32 1.0, %v3088_v48 }
 0x600   :  { %3093 = vrcp.f32 %v2313_v49 }
 0x601   :  { %3095 = vrcp.f32 %v2317_v50 }
 0x608   :  { %v3090_v51 = vpop.eup %3089 }
 0x609   :  { %v3092_v52 = vpop.eup %3091  ;;  %2326 = vst [vmem:[%s4093_s13] sm:$0xff] %v3090_v51 }
 0x60a   :  { %v3094_v53 = vpop.eup %3093  ;;  %2330 = vst [vmem:[%s4093_s13 + $0x20] sm:$0xff] %v3092_v52 }
 0x60b   :  { %v3096_v54 = vpop.eup %3095  ;;  %2327 = vst [vmem:[%s4093_s13 + $0x8] sm:$0xff] %v3094_v53 }
 0x60c   :  { %2331 = vst [vmem:[%s4093_s13 + $0x28] sm:$0xff] %v3096_v54 }
 0x62a   :  { %v2203_v58 = vpop.f32.mrb[20].mxu1 }
 0x62b   :  { %v2204_v60 = vadd.f32 %v2203_v58, %v1528_v57  ;;  %v2205_v61 = vpop.f32.mrb[21].mxu1 }
 0x62c   :  { %v2206_v62 = vadd.f32 %v2205_v61, %v1532_v59  ;;  %v2207_v63 = vpop.f32.mrb[22].mxu1 }
 0x62d   :  { %v2293_v0 = vsub.f32 0.0, %v2204_v60  ;;  %v2208_v1 = vpop.f32.mrb[23].mxu1 }
 0x62e   :  { %v2294_v2 = vsub.f32 0.0, %v2206_v62 }
 0x62f   :  { %v2302_v5 = vmul.f32 1.442695, %v2293_v0 }
 0x630   :  { %v2304_v7 = vmul.f32 1.442695, %v2294_v2 }
 0x631   :  { %3097 = vpow2.f32 %v2302_v5 }
 0x632   :  { %3099 = vpow2.f32 %v2304_v7 }
 0x63b   :  { %v3098_v8 = vpop.eup %3097 }
 0x63c   :  { %v3100_v9 = vpop.eup %3099  ;;  %v2314_v10 = vadd.f32 1.0, %v3098_v8 }
 0x63d   :  { %v2315_v11 = vadd.f32 1.0, %v3100_v9 }
 0x63e   :  { %3101 = vrcp.f32 %v2314_v10 }
 0x63f   :  { %3103 = vrcp.f32 %v2315_v11 }
 0x648   :  { %v3102_v13 = vpop.eup %3101 }
 0x649   :  { %v3104_v14 = vpop.eup %3103  ;;  %2328 = vst [vmem:[%s4093_s13 + $0x10] sm:$0xff] %v3102_v13 }
 0x64a   :  { %2329 = vst [vmem:[%s4093_s13 + $0x18] sm:$0xff] %v3104_v14  ;;  %v2655_v15 = vpop.f32.mrb[24].mxu1 }
 0x64b   :  { %v2656_v17 = vpop.f32.mrb[25].mxu1 }
 0x64c   :  { %v2657_v18 = vadd.f32 %v2656_v17, %v2655_v15  ;;  %v2658_v20 = vpop.f32.mrb[26].mxu1 }
 0x64d   :  { %v2659_v21 = vpop.f32.mrb[27].mxu1 }
 0x64e   :  { %v2286_v22 = vadd.f32 %v2657_v18, %v1544_v16 }
 0x650   :  { %v2297_v23 = vsub.f32 0.0, %v2286_v22 }
 0x652   :  { %v2310_v3 = vmul.f32 1.442695, %v2297_v23 }
 0x654   :  { %3105 = vpow2.f32 %v2310_v3 }
 0x65e   :  { %v3106_v24 = vpop.eup %3105 }
 0x65f   :  { %v2318_v25 = vadd.f32 1.0, %v3106_v24 }
 0x661   :  { %3107 = vrcp.f32 %v2318_v25 }
 0x66b   :  { %v3108_v26 = vpop.eup %3107 }
 0x66c   :  { %2332 = vst.msk [vmem:[%s4093_s13 + $0x30] sm:$0xff] %vm659_vm0, %v3108_v26 }

</bundles_post_ra>
